<compile_context>
chip_gen: v7x
topology: tpu7x:2x2x1
jax: 0.10.0
libtpu: 0.0.40
codegen_flags: <defaults>
</compile_context>

<pallas_src>
import math

import jax
import jax.numpy as jnp
import numpy as np
from jax.experimental import pallas as pl
from jax.experimental.pallas import tpu as pltpu

# ---------------- synthetic config (small, consistent with the module) --------
SLOT_DIM = 16                       # hard-coded latent dim in the module
TRANS_DIM = SLOT_DIM + 2            # 18
N_HEADS = 2                         # cfg.CLEVRERMAIN.T_HEADS (must divide 18)
HEAD_DIM = TRANS_DIM // N_HEADS     # 9 (real)
HP = 16                             # lane-aligned padded head dim
HID_DIM = 32                        # cfg.CLEVRERMAIN.T_HID_DIM
N_LAYERS = 2                        # cfg.CLEVRERMAIN.T_LAYERS
PRED_HEAD_DIM = 32                  # cfg.CLEVRERMAIN.PRED_HEAD_DIM
VOCAB_LEN = 32
ANS_VOCAB_LEN = 10
LN_EPS = 1e-5
OUT_WIDTH = 128                     # lane-dense padded answer width

# 128-lane-aligned offsets inside the packed per-layer weight slab.
_WD_ROWS = 32
_WD_WIDTH = 512
_QKV_OFF = 0          # fused padded [Wq | Wk | Wv]   : (D, 3*NH*HP = 96)
_W1_OFF = 128         # FFN first linear              : (D, HID_DIM = 32)
_WO_OFF = 256         # fused attn output proj        : (NH*HP = 32, D = 18)
_W2_OFF = 384         # FFN second linear             : (HID_DIM = 32, D = 18)


# ------------------------------- shared math ----------------------------------
def _layernorm(x, g, b):
    m = jnp.mean(x, axis=-1, keepdims=True)
    v = jnp.mean(jnp.square(x - m), axis=-1, keepdims=True)
    return (x - m) * jax.lax.rsqrt(v + LN_EPS) * g + b


# ------------------------------- Pallas kernel --------------------------------
def clevrer_kernel(x_ref, pe_ref, wd_ref, b_ref, hw1_ref, hw2_ref, hb_ref, out_ref):
    BB, L, D = x_ref.shape
    BL = BB * L
    NHHP = N_HEADS * HP
    inv_sqrt_hd = jnp.float32(1.0 / math.sqrt(HEAD_DIM))

    # Transformer front-end: scale by sqrt(d_model) + sinusoidal positional enc.
    x3 = x_ref[...].astype(jnp.float32) * jnp.float32(math.sqrt(D)) + pe_ref[...]
    x = x3.reshape(BL, D)                                 # batch-flattened rows

    for l in range(N_LAYERS):
        wd = wd_ref[l]                                    # (32, 512) one load/layer
        bias = b_ref[l]                                   # (8, 128)  one load/layer
        w_qkv = wd[0:D, _QKV_OFF:_QKV_OFF + 3 * NHHP]     # (D, 96)
        w_1 = wd[0:D, _W1_OFF:_W1_OFF + HID_DIM]          # (D, 32)
        w_o = wd[0:NHHP, _WO_OFF:_WO_OFF + D]             # (32, D)
        w_2 = wd[0:HID_DIM, _W2_OFF:_W2_OFF + D]          # (32, D)
        b_qkv = bias[0:1, 0:3 * NHHP]
        b_o = bias[1:2, 0:D]
        b_1 = bias[2:3, 0:HID_DIM]
        b_2 = bias[3:4, 0:D]
        ln1g = bias[4:5, 0:D]
        ln1b = bias[5:6, 0:D]
        ln2g = bias[6:7, 0:D]
        ln2b = bias[7:8, 0:D]

        # -- multi-head self-attention (post-norm encoder layer) --
        qkv = jnp.dot(x, w_qkv, preferred_element_type=jnp.float32) + b_qkv   # (BL, 96)
        qkv3 = qkv.reshape(BB, L, 3 * NHHP)

        ctx_heads = []
        for h in range(N_HEADS):
            qo = h * HP
            ko = NHHP + h * HP
            vo = 2 * NHHP + h * HP
            qh = qkv3[:, :, qo:qo + HP]                   # 16-lane aligned slices
            kh = qkv3[:, :, ko:ko + HP]
            vh = qkv3[:, :, vo:vo + HP]
            s = jnp.einsum("bld,bmd->blm", qh, kh,
                           preferred_element_type=jnp.float32) * inv_sqrt_hd
            s = s - jnp.max(s, axis=-1, keepdims=True)
            p = jnp.exp(s)
            p = p * pl.reciprocal(jnp.sum(p, axis=-1, keepdims=True), approx=True)
            ctx_heads.append(jnp.einsum("blm,bmd->bld", p, vh,
                                        preferred_element_type=jnp.float32))
        # lane-aligned width-16 concat, then one fused output projection
        ctx = jnp.concatenate(ctx_heads, axis=-1).reshape(BL, NHHP)           # (BL, 32)
        attn = jnp.dot(ctx, w_o, preferred_element_type=jnp.float32) + b_o    # (BL, D)
        x = _layernorm(x + attn, ln1g, ln1b)

        # -- feed-forward (ReLU) --
        ff = jnp.maximum(jnp.dot(x, w_1, preferred_element_type=jnp.float32) + b_1, 0.0)
        ff = jnp.dot(ff, w_2, preferred_element_type=jnp.float32) + b_2
        x = _layernorm(x + ff, ln2g, ln2b)

    # -- prediction head on the CLS token (row 0 of each batch element) --
    cls = x.reshape(BB, L, D)[:, 0, :]                    # (BB, D)
    hb = hb_ref[...]                                      # (2, 128)
    hdn = jnp.maximum(
        jnp.dot(cls, hw1_ref[...], preferred_element_type=jnp.float32)
        + hb[0:1, 0:PRED_HEAD_DIM], 0.0)                  # (BB, 32)
    ans = jnp.dot(hdn, hw2_ref[...], preferred_element_type=jnp.float32) + hb[1:2, :]
    out_ref[...] = ans.astype(out_ref.dtype)              # lane-dense (BB, 128) store


def run_transformer_head(x, pe, packed, batch_block=None):
    """x: (B, L, D) assembled sequence. Returns (B, OUT_WIDTH) padded logits."""
    B, L, D = x.shape
    BB = B if batch_block is None else min(batch_block, B)
    # output block second-to-last dim must be the full batch or a multiple of 8
    assert B % BB == 0 and (BB == B or BB % 8 == 0)
    grid = (B // BB,)        # whole batch per step by default -> grid of 1

    def const_spec(a):
        nd = a.ndim
        return pl.BlockSpec(a.shape, lambda i, nd=nd: (0,) * nd)

    in_specs = ([pl.BlockSpec((BB, L, D), lambda i: (i, 0, 0)), const_spec(pe)]
                + [const_spec(w) for w in packed])

    out = pl.pallas_call(
        clevrer_kernel,
        out_shape=jax.ShapeDtypeStruct((B, OUT_WIDTH), jnp.float32),
        grid=grid,
        in_specs=in_specs,
        out_specs=pl.BlockSpec((BB, OUT_WIDTH), lambda i: (i, 0)),
        compiler_params=pltpu.CompilerParams(dimension_semantics=("parallel",)),
    )(x, pe, *packed)
    return out


# --------------------------- weight slab packing --------------------------------
def pack_weights(params, head):
    """Fuse per-head projections (head dim padded 9->16) into lane-dense slabs."""
    NL, NH, D, HD, H = N_LAYERS, N_HEADS, TRANS_DIM, HEAD_DIM, HID_DIM

    def pad_w(w):   # (NL, NH, D, HD) -> (NL, D, NH*HP), zero pad lanes per head
        w = jnp.transpose(w, (0, 2, 1, 3))                         # (NL, D, NH, HD)
        w = jnp.pad(w, ((0, 0), (0, 0), (0, 0), (0, HP - HD)))
        return w.reshape(NL, D, NH * HP)

    def pad_b(b):   # (NL, NH, 1, HD) -> (NL, NH*HP), zero pad lanes per head
        b = jnp.transpose(b, (0, 2, 1, 3))                         # (NL, 1, NH, HD)
        b = jnp.pad(b, ((0, 0), (0, 0), (0, 0), (0, HP - HD)))
        return b.reshape(NL, NH * HP)

    w_qkv = jnp.concatenate([pad_w(params["wq"]), pad_w(params["wk"]),
                             pad_w(params["wv"])], axis=-1)        # (NL, D, 3*NH*HP)
    b_qkv = jnp.concatenate([pad_b(params["bq"]), pad_b(params["bk"]),
                             pad_b(params["bv"])], axis=-1)        # (NL, 3*NH*HP)
    # output proj: pad the per-head input rows 9->16 with zeros, heads stacked
    w_o = jnp.pad(params["wo"],
                  ((0, 0), (0, 0), (0, HP - HD), (0, 0))).reshape(NL, NH * HP, D)

    wd = jnp.zeros((NL, _WD_ROWS, _WD_WIDTH), jnp.float32)
    wd = wd.at[:, 0:D, _QKV_OFF:_QKV_OFF + 3 * NH * HP].set(w_qkv)
    wd = wd.at[:, 0:D, _W1_OFF:_W1_OFF + H].set(params["w1"])
    wd = wd.at[:, 0:NH * HP, _WO_OFF:_WO_OFF + D].set(w_o)
    wd = wd.at[:, 0:H, _W2_OFF:_W2_OFF + D].set(params["w2"])

    bs = jnp.zeros((NL, 8, 128), jnp.float32)
    bs = bs.at[:, 0, 0:3 * NH * HP].set(b_qkv)
    bs = bs.at[:, 1, 0:D].set(params["bo"][:, 0, :])
    bs = bs.at[:, 2, 0:H].set(params["b1"][:, 0, :])
    bs = bs.at[:, 3, 0:D].set(params["b2"][:, 0, :])
    bs = bs.at[:, 4, 0:D].set(params["ln1g"][:, 0, :])
    bs = bs.at[:, 5, 0:D].set(params["ln1b"][:, 0, :])
    bs = bs.at[:, 6, 0:D].set(params["ln2g"][:, 0, :])
    bs = bs.at[:, 7, 0:D].set(params["ln2b"][:, 0, :])

    A = head["w2"].shape[-1]
    hw2p = jnp.zeros((PRED_HEAD_DIM, OUT_WIDTH), jnp.float32)
    hw2p = hw2p.at[:, 0:A].set(head["w2"])                 # zero pad answer columns
    hb = jnp.zeros((2, OUT_WIDTH), jnp.float32)
    hb = hb.at[0, 0:PRED_HEAD_DIM].set(head["b1"][0])
    hb = hb.at[1, 0:A].set(head["b2"][0])

    packed = [wd, bs, head["w1"], hw2p, hb]
    return packed, A


# ------------------------------- JAX glue --------------------------------------
def sinusoidal_pe(L, D):
    pos = jnp.arange(L, dtype=jnp.float32)[:, None]
    i = jnp.arange(0, D, 2, dtype=jnp.float32)[None, :]
    div = jnp.exp(-i * (math.log(10000.0) / D))
    pe = jnp.zeros((L, D), jnp.float32)
    pe = pe.at[:, 0::2].set(jnp.sin(pos * div))
    pe = pe.at[:, 1::2].set(jnp.cos(pos * div))
    return pe


def assemble_input(params, clips_b, question_b):
    """ClevrerMain.assemble_input: <CLS, slots, words>, each tagged with a 2-d one-hot."""
    embed = params["embed"]
    B, S, _ = clips_b.shape
    Q = question_b.shape[1]
    word_embs = embed[question_b] * math.sqrt(SLOT_DIM)           # (B, Q, 16)
    cls = jnp.concatenate(
        [jnp.broadcast_to(embed[0], (B, 1, SLOT_DIM)), jnp.zeros((B, 1, 2), jnp.float32)],
        axis=2)
    slots = jnp.concatenate(
        [clips_b, jnp.ones((B, S, 1), jnp.float32), jnp.zeros((B, S, 1), jnp.float32)],
        axis=2)
    words = jnp.concatenate(
        [word_embs, jnp.zeros((B, Q, 1), jnp.float32), jnp.ones((B, Q, 1), jnp.float32)],
        axis=2)
    return jnp.concatenate([cls, slots, words], axis=1).astype(jnp.float32)   # (B, L, 18)


def clevrer_forward(params, clips_b, question_b, is_des_q, batch_block=None):
    x = assemble_input(params, clips_b, question_b)
    pe = sinusoidal_pe(x.shape[1], TRANS_DIM)
    head = params["des_head"] if is_des_q else params["mc_head"]
    packed, ans_dim = pack_weights(params, head)
    out = run_transformer_head(x, pe, packed, batch_block=batch_block)
    return out[:, :ans_dim]


# --------------------------- deterministic init --------------------------------
def init_params(key):
    ks = iter(jax.random.split(key, 32))

    def nrm(shape, scale=0.1):
        return jax.random.normal(next(ks), shape, jnp.float32) * scale

    D, HD, NH, NL, H = TRANS_DIM, HEAD_DIM, N_HEADS, N_LAYERS, HID_DIM
    p = {
        "embed": nrm((VOCAB_LEN, SLOT_DIM), 1.0),
        "wq": nrm((NL, NH, D, HD)), "wk": nrm((NL, NH, D, HD)), "wv": nrm((NL, NH, D, HD)),
        "bq": nrm((NL, NH, 1, HD)), "bk": nrm((NL, NH, 1, HD)), "bv": nrm((NL, NH, 1, HD)),
        "wo": nrm((NL, NH, HD, D)), "bo": nrm((NL, 1, D)),
        "ln1g": jnp.ones((NL, 1, D), jnp.float32), "ln1b": jnp.zeros((NL, 1, D), jnp.float32),
        "w1": nrm((NL, D, H)), "b1": nrm((NL, 1, H)),
        "w2": nrm((NL, H, D)), "b2": nrm((NL, 1, D)),
        "ln2g": jnp.ones((NL, 1, D), jnp.float32), "ln2b": jnp.zeros((NL, 1, D), jnp.float32),
        "des_head": {"w1": nrm((D, PRED_HEAD_DIM)), "b1": nrm((1, PRED_HEAD_DIM)),
                     "w2": nrm((PRED_HEAD_DIM, ANS_VOCAB_LEN)), "b2": nrm((1, ANS_VOCAB_LEN))},
        "mc_head": {"w1": nrm((D, PRED_HEAD_DIM)), "b1": nrm((1, PRED_HEAD_DIM)),
                    "w2": nrm((PRED_HEAD_DIM, 4)), "b2": nrm((1, 4))},
    }
    return p


# --------------------------- pure-JAX reference ---------------------------------
def reference_forward(params, clips_b, question_b, is_des_q):
    x = assemble_input(params, clips_b, question_b)
    pe = sinusoidal_pe(x.shape[1], TRANS_DIM)
    x = x * math.sqrt(TRANS_DIM) + pe[None]
    for l in range(N_LAYERS):
        attn = jnp.zeros_like(x)
        for h in range(N_HEADS):
            q = x @ params["wq"][l, h] + params["bq"][l, h]
            k = x @ params["wk"][l, h] + params["bk"][l, h]
            v = x @ params["wv"][l, h] + params["bv"][l, h]
            s = jnp.einsum("bld,bmd->blm", q, k) / math.sqrt(HEAD_DIM)
            p = jax.nn.softmax(s, axis=-1)
            attn = attn + jnp.einsum("blm,bmd->bld", p, v) @ params["wo"][l, h]
        attn = attn + params["bo"][l]
        x = _layernorm(x + attn, params["ln1g"][l], params["ln1b"][l])
        ff = jax.nn.relu(x @ params["w1"][l] + params["b1"][l])
        ff = ff @ params["w2"][l] + params["b2"][l]
        x = _layernorm(x + ff, params["ln2g"][l], params["ln2b"][l])
    head = params["des_head"] if is_des_q else params["mc_head"]
    cls = x[:, 0]
    return jax.nn.relu(cls @ head["w1"] + head["b1"]) @ head["w2"] + head["b2"]


# --------------------------------- main ------------------------------------------
if __name__ == "__main__":
    key = jax.random.PRNGKey(0)
    kp, kc, kq = jax.random.split(key, 3)
    params = init_params(kp)

    # S = T * num_slots (2 frames x 4 slots), Q question tokens; L = 1+S+Q = 16
    B, S, Q = 2, 8, 7
    clips_b = jax.random.normal(kc, (B, S, SLOT_DIM), jnp.float32)   # slots: B x S x 16
    question_b = jax.random.randint(kq, (B, Q), 0, VOCAB_LEN)        # token ids: B x Q

    ans = clevrer_forward(params, clips_b, question_b, is_des_q=True)
    ans = jax.block_until_ready(ans)
    assert ans.shape == (B, ANS_VOCAB_LEN)

    ref = reference_forward(params, clips_b, question_b, True)
    np.testing.assert_allclose(np.asarray(ans), np.asarray(ref), rtol=5e-2, atol=5e-2)

    print("KERNEL_OK")
</pallas_src>

<mosaic_0001>
module attributes {stable_mosaic.version = 11 : i64} {
  func.func @clevrer_kernel(%arg0: i32, %arg1: memref<2x16x18xf32, #tpu.memory_space<vmem>>, %arg2: memref<16x18xf32, #tpu.memory_space<vmem>>, %arg3: memref<2x32x512xf32, #tpu.memory_space<vmem>>, %arg4: memref<2x8x128xf32, #tpu.memory_space<vmem>>, %arg5: memref<18x32xf32, #tpu.memory_space<vmem>>, %arg6: memref<32x128xf32, #tpu.memory_space<vmem>>, %arg7: memref<2x128xf32, #tpu.memory_space<vmem>>, %arg8: memref<2x128xf32, #tpu.memory_space<vmem>>) attributes {dimension_semantics = [#tpu.dimension_semantics<parallel>], iteration_bounds = array<i64: 1>, scalar_prefetch = 0 : i64, scratch_operands = 0 : i64, tpu.core_type = #tpu.core_type<tc>, window_params = [{transform_indices = @transform_0, window_bounds = array<i64: 2, 16, 18>}, {pipeline_mode = #tpu.pipeline_mode<synchronous>, transform_indices = @transform_1, window_bounds = array<i64: 16, 18>}, {pipeline_mode = #tpu.pipeline_mode<synchronous>, transform_indices = @transform_2, window_bounds = array<i64: 2, 32, 512>}, {pipeline_mode = #tpu.pipeline_mode<synchronous>, transform_indices = @transform_3, window_bounds = array<i64: 2, 8, 128>}, {pipeline_mode = #tpu.pipeline_mode<synchronous>, transform_indices = @transform_4, window_bounds = array<i64: 18, 32>}, {pipeline_mode = #tpu.pipeline_mode<synchronous>, transform_indices = @transform_5, window_bounds = array<i64: 32, 128>}, {pipeline_mode = #tpu.pipeline_mode<synchronous>, transform_indices = @transform_6, window_bounds = array<i64: 2, 128>}, {transform_indices = @transform_7, window_bounds = array<i64: 2, 128>}]} {
    %c0 = arith.constant 0 : index
    %c0_0 = arith.constant 0 : index
    %c0_1 = arith.constant 0 : index
    %0 = vector.load %arg1[%c0, %c0_0, %c0_1] : memref<2x16x18xf32, #tpu.memory_space<vmem>>, vector<2x16x18xf32>
    %cst = arith.constant 4.2426405 : f32
    %1 = vector.broadcast %cst : f32 to vector<2x16x18xf32>
    %2 = arith.mulf %0, %1 : vector<2x16x18xf32>
    %c0_2 = arith.constant 0 : index
    %c0_3 = arith.constant 0 : index
    %3 = vector.load %arg2[%c0_2, %c0_3] : memref<16x18xf32, #tpu.memory_space<vmem>>, vector<16x18xf32>
    %4 = vector.shape_cast %3 : vector<16x18xf32> to vector<1x16x18xf32>
    %5 = vector.broadcast %4 : vector<1x16x18xf32> to vector<2x16x18xf32>
    %6 = arith.addf %2, %5 : vector<2x16x18xf32>
    %7 = vector.shape_cast %6 : vector<2x16x18xf32> to vector<32x18xf32>
    %c0_4 = arith.constant 0 : index
    %c0_5 = arith.constant 0 : index
    %c0_6 = arith.constant 0 : index
    %8 = vector.load %arg3[%c0_4, %c0_5, %c0_6] : memref<2x32x512xf32, #tpu.memory_space<vmem>>, vector<1x32x512xf32>
    %9 = vector.shape_cast %8 : vector<1x32x512xf32> to vector<32x512xf32>
    %c0_7 = arith.constant 0 : index
    %c0_8 = arith.constant 0 : index
    %c0_9 = arith.constant 0 : index
    %10 = vector.load %arg4[%c0_7, %c0_8, %c0_9] : memref<2x8x128xf32, #tpu.memory_space<vmem>>, vector<1x8x128xf32>
    %11 = vector.shape_cast %10 : vector<1x8x128xf32> to vector<8x128xf32>
    %12 = vector.extract_strided_slice %9 {offsets = [0, 0], sizes = [18, 96], strides = [1, 1]} : vector<32x512xf32> to vector<18x96xf32>
    %13 = vector.extract_strided_slice %9 {offsets = [0, 128], sizes = [18, 32], strides = [1, 1]} : vector<32x512xf32> to vector<18x32xf32>
    %14 = vector.extract_strided_slice %9 {offsets = [0, 256], sizes = [32, 18], strides = [1, 1]} : vector<32x512xf32> to vector<32x18xf32>
    %15 = vector.extract_strided_slice %9 {offsets = [0, 384], sizes = [32, 18], strides = [1, 1]} : vector<32x512xf32> to vector<32x18xf32>
    %16 = vector.extract_strided_slice %11 {offsets = [0, 0], sizes = [1, 96], strides = [1, 1]} : vector<8x128xf32> to vector<1x96xf32>
    %17 = vector.extract_strided_slice %11 {offsets = [1, 0], sizes = [1, 18], strides = [1, 1]} : vector<8x128xf32> to vector<1x18xf32>
    %18 = vector.extract_strided_slice %11 {offsets = [2, 0], sizes = [1, 32], strides = [1, 1]} : vector<8x128xf32> to vector<1x32xf32>
    %19 = vector.extract_strided_slice %11 {offsets = [3, 0], sizes = [1, 18], strides = [1, 1]} : vector<8x128xf32> to vector<1x18xf32>
    %20 = vector.extract_strided_slice %11 {offsets = [4, 0], sizes = [1, 18], strides = [1, 1]} : vector<8x128xf32> to vector<1x18xf32>
    %21 = vector.extract_strided_slice %11 {offsets = [5, 0], sizes = [1, 18], strides = [1, 1]} : vector<8x128xf32> to vector<1x18xf32>
    %22 = vector.extract_strided_slice %11 {offsets = [6, 0], sizes = [1, 18], strides = [1, 1]} : vector<8x128xf32> to vector<1x18xf32>
    %23 = vector.extract_strided_slice %11 {offsets = [7, 0], sizes = [1, 18], strides = [1, 1]} : vector<8x128xf32> to vector<1x18xf32>
    %cst_10 = arith.constant dense<0.000000e+00> : vector<32x96xf32>
    %24 = tpu.matmul %7, %12, %cst_10 {dimension_numbers = #tpu.dot_dimension_numbers<[1], [0], [0], [1], [0, 0, 1, 1], [], []>} : vector<32x18xf32>, vector<18x96xf32>, vector<32x96xf32> -> vector<32x96xf32>
    %25 = vector.broadcast %16 : vector<1x96xf32> to vector<32x96xf32>
    %26 = arith.addf %24, %25 : vector<32x96xf32>
    %27 = vector.shape_cast %26 : vector<32x96xf32> to vector<2x16x96xf32>
    %28 = vector.extract_strided_slice %27 {offsets = [0, 0, 0], sizes = [2, 16, 16], strides = [1, 1, 1]} : vector<2x16x96xf32> to vector<2x16x16xf32>
    %29 = vector.extract_strided_slice %27 {offsets = [0, 0, 32], sizes = [2, 16, 16], strides = [1, 1, 1]} : vector<2x16x96xf32> to vector<2x16x16xf32>
    %30 = vector.extract_strided_slice %27 {offsets = [0, 0, 64], sizes = [2, 16, 16], strides = [1, 1, 1]} : vector<2x16x96xf32> to vector<2x16x16xf32>
    "tpu.trace_start"() <{level = 10 : i32, message = "bld,bmd->blm"}> : () -> ()
    %cst_11 = arith.constant dense<0.000000e+00> : vector<2x16x16xf32>
    %31 = tpu.matmul %28, %29, %cst_11 {dimension_numbers = #tpu.dot_dimension_numbers<[2], [2], [1], [1], [0, 0, 0, 1, 1, 1], [0], [0]>} : vector<2x16x16xf32>, vector<2x16x16xf32>, vector<2x16x16xf32> -> vector<2x16x16xf32>
    "tpu.trace_stop"() : () -> ()
    %cst_12 = arith.constant 0.333333343 : f32
    %32 = vector.broadcast %cst_12 : f32 to vector<2x16x16xf32>
    %33 = arith.mulf %31, %32 : vector<2x16x16xf32>
    %cst_13 = arith.constant dense<0xFF800000> : vector<2x16xf32>
    %34 = vector.multi_reduction <maximumf>, %33, %cst_13 [2] : vector<2x16x16xf32> to vector<2x16xf32>
    %35 = vector.shape_cast %34 : vector<2x16xf32> to vector<2x16x1xf32>
    %36 = vector.broadcast %35 : vector<2x16x1xf32> to vector<2x16x16xf32>
    %37 = arith.subf %33, %36 : vector<2x16x16xf32>
    %38 = math.exp %37 : vector<2x16x16xf32>
    %cst_14 = arith.constant dense<0.000000e+00> : vector<2x16xf32>
    %39 = vector.multi_reduction <add>, %38, %cst_14 [2] : vector<2x16x16xf32> to vector<2x16xf32>
    %40 = vector.shape_cast %39 : vector<2x16xf32> to vector<2x16x1xf32>
    %41 = tpu.reciprocal %40 {approx = true} : vector<2x16x1xf32> -> vector<2x16x1xf32>
    %42 = vector.broadcast %41 : vector<2x16x1xf32> to vector<2x16x16xf32>
    %43 = arith.mulf %38, %42 : vector<2x16x16xf32>
    "tpu.trace_start"() <{level = 10 : i32, message = "blm,bmd->bld"}> : () -> ()
    %cst_15 = arith.constant dense<0.000000e+00> : vector<2x16x16xf32>
    %44 = tpu.matmul %43, %30, %cst_15 {dimension_numbers = #tpu.dot_dimension_numbers<[2], [1], [1], [2], [0, 0, 0, 1, 1, 2], [0], [0]>} : vector<2x16x16xf32>, vector<2x16x16xf32>, vector<2x16x16xf32> -> vector<2x16x16xf32>
    "tpu.trace_stop"() : () -> ()
    %45 = vector.extract_strided_slice %27 {offsets = [0, 0, 16], sizes = [2, 16, 16], strides = [1, 1, 1]} : vector<2x16x96xf32> to vector<2x16x16xf32>
    %46 = vector.extract_strided_slice %27 {offsets = [0, 0, 48], sizes = [2, 16, 16], strides = [1, 1, 1]} : vector<2x16x96xf32> to vector<2x16x16xf32>
    %47 = vector.extract_strided_slice %27 {offsets = [0, 0, 80], sizes = [2, 16, 16], strides = [1, 1, 1]} : vector<2x16x96xf32> to vector<2x16x16xf32>
    "tpu.trace_start"() <{level = 10 : i32, message = "bld,bmd->blm"}> : () -> ()
    %cst_16 = arith.constant dense<0.000000e+00> : vector<2x16x16xf32>
    %48 = tpu.matmul %45, %46, %cst_16 {dimension_numbers = #tpu.dot_dimension_numbers<[2], [2], [1], [1], [0, 0, 0, 1, 1, 1], [0], [0]>} : vector<2x16x16xf32>, vector<2x16x16xf32>, vector<2x16x16xf32> -> vector<2x16x16xf32>
    "tpu.trace_stop"() : () -> ()
    %cst_17 = arith.constant 0.333333343 : f32
    %49 = vector.broadcast %cst_17 : f32 to vector<2x16x16xf32>
    %50 = arith.mulf %48, %49 : vector<2x16x16xf32>
    %cst_18 = arith.constant dense<0xFF800000> : vector<2x16xf32>
    %51 = vector.multi_reduction <maximumf>, %50, %cst_18 [2] : vector<2x16x16xf32> to vector<2x16xf32>
    %52 = vector.shape_cast %51 : vector<2x16xf32> to vector<2x16x1xf32>
    %53 = vector.broadcast %52 : vector<2x16x1xf32> to vector<2x16x16xf32>
    %54 = arith.subf %50, %53 : vector<2x16x16xf32>
    %55 = math.exp %54 : vector<2x16x16xf32>
    %cst_19 = arith.constant dense<0.000000e+00> : vector<2x16xf32>
    %56 = vector.multi_reduction <add>, %55, %cst_19 [2] : vector<2x16x16xf32> to vector<2x16xf32>
    %57 = vector.shape_cast %56 : vector<2x16xf32> to vector<2x16x1xf32>
    %58 = tpu.reciprocal %57 {approx = true} : vector<2x16x1xf32> -> vector<2x16x1xf32>
    %59 = vector.broadcast %58 : vector<2x16x1xf32> to vector<2x16x16xf32>
    %60 = arith.mulf %55, %59 : vector<2x16x16xf32>
    "tpu.trace_start"() <{level = 10 : i32, message = "blm,bmd->bld"}> : () -> ()
    %cst_20 = arith.constant dense<0.000000e+00> : vector<2x16x16xf32>
    %61 = tpu.matmul %60, %47, %cst_20 {dimension_numbers = #tpu.dot_dimension_numbers<[2], [1], [1], [2], [0, 0, 0, 1, 1, 2], [0], [0]>} : vector<2x16x16xf32>, vector<2x16x16xf32>, vector<2x16x16xf32> -> vector<2x16x16xf32>
    "tpu.trace_stop"() : () -> ()
    %62 = tpu.concatenate %44, %61 in 2 : vector<2x16x16xf32>, vector<2x16x16xf32> -> vector<2x16x32xf32>
    %63 = vector.shape_cast %62 : vector<2x16x32xf32> to vector<32x32xf32>
    %cst_21 = arith.constant dense<0.000000e+00> : vector<32x18xf32>
    %64 = tpu.matmul %63, %14, %cst_21 {dimension_numbers = #tpu.dot_dimension_numbers<[1], [0], [0], [1], [0, 0, 1, 1], [], []>} : vector<32x32xf32>, vector<32x18xf32>, vector<32x18xf32> -> vector<32x18xf32>
    %65 = vector.broadcast %17 : vector<1x18xf32> to vector<32x18xf32>
    %66 = arith.addf %64, %65 : vector<32x18xf32>
    %67 = arith.addf %7, %66 : vector<32x18xf32>
    %cst_22 = arith.constant dense<0.000000e+00> : vector<32xf32>
    %68 = vector.multi_reduction <add>, %67, %cst_22 [1] : vector<32x18xf32> to vector<32xf32>
    %69 = vector.shape_cast %68 : vector<32xf32> to vector<32x1xf32>
    %cst_23 = arith.constant 1.800000e+01 : f32
    %70 = vector.broadcast %cst_23 : f32 to vector<32x1xf32>
    %71 = arith.divf %69, %70 : vector<32x1xf32>
    %72 = vector.broadcast %71 : vector<32x1xf32> to vector<32x18xf32>
    %73 = arith.subf %67, %72 : vector<32x18xf32>
    %74 = arith.mulf %73, %73 : vector<32x18xf32>
    %cst_24 = arith.constant dense<0.000000e+00> : vector<32xf32>
    %75 = vector.multi_reduction <add>, %74, %cst_24 [1] : vector<32x18xf32> to vector<32xf32>
    %76 = vector.shape_cast %75 : vector<32xf32> to vector<32x1xf32>
    %cst_25 = arith.constant 1.800000e+01 : f32
    %77 = vector.broadcast %cst_25 : f32 to vector<32x1xf32>
    %78 = arith.divf %76, %77 : vector<32x1xf32>
    %79 = vector.broadcast %71 : vector<32x1xf32> to vector<32x18xf32>
    %80 = arith.subf %67, %79 : vector<32x18xf32>
    %cst_26 = arith.constant 9.99999974E-6 : f32
    %81 = vector.broadcast %cst_26 : f32 to vector<32x1xf32>
    %82 = arith.addf %78, %81 : vector<32x1xf32>
    %83 = math.rsqrt %82 : vector<32x1xf32>
    %84 = vector.broadcast %83 : vector<32x1xf32> to vector<32x18xf32>
    %85 = arith.mulf %80, %84 : vector<32x18xf32>
    %86 = vector.broadcast %20 : vector<1x18xf32> to vector<32x18xf32>
    %87 = arith.mulf %85, %86 : vector<32x18xf32>
    %88 = vector.broadcast %21 : vector<1x18xf32> to vector<32x18xf32>
    %89 = arith.addf %87, %88 : vector<32x18xf32>
    %cst_27 = arith.constant dense<0.000000e+00> : vector<32x32xf32>
    %90 = tpu.matmul %89, %13, %cst_27 {dimension_numbers = #tpu.dot_dimension_numbers<[1], [0], [0], [1], [0, 0, 1, 1], [], []>} : vector<32x18xf32>, vector<18x32xf32>, vector<32x32xf32> -> vector<32x32xf32>
    %91 = vector.broadcast %18 : vector<1x32xf32> to vector<32x32xf32>
    %92 = arith.addf %90, %91 : vector<32x32xf32>
    %cst_28 = arith.constant 0.000000e+00 : f32
    %93 = vector.broadcast %cst_28 : f32 to vector<32x32xf32>
    %94 = arith.maximumf %92, %93 : vector<32x32xf32>
    %cst_29 = arith.constant dense<0.000000e+00> : vector<32x18xf32>
    %95 = tpu.matmul %94, %15, %cst_29 {dimension_numbers = #tpu.dot_dimension_numbers<[1], [0], [0], [1], [0, 0, 1, 1], [], []>} : vector<32x32xf32>, vector<32x18xf32>, vector<32x18xf32> -> vector<32x18xf32>
    %96 = vector.broadcast %19 : vector<1x18xf32> to vector<32x18xf32>
    %97 = arith.addf %95, %96 : vector<32x18xf32>
    %98 = arith.addf %89, %97 : vector<32x18xf32>
    %cst_30 = arith.constant dense<0.000000e+00> : vector<32xf32>
    %99 = vector.multi_reduction <add>, %98, %cst_30 [1] : vector<32x18xf32> to vector<32xf32>
    %100 = vector.shape_cast %99 : vector<32xf32> to vector<32x1xf32>
    %cst_31 = arith.constant 1.800000e+01 : f32
    %101 = vector.broadcast %cst_31 : f32 to vector<32x1xf32>
    %102 = arith.divf %100, %101 : vector<32x1xf32>
    %103 = vector.broadcast %102 : vector<32x1xf32> to vector<32x18xf32>
    %104 = arith.subf %98, %103 : vector<32x18xf32>
    %105 = arith.mulf %104, %104 : vector<32x18xf32>
    %cst_32 = arith.constant dense<0.000000e+00> : vector<32xf32>
    %106 = vector.multi_reduction <add>, %105, %cst_32 [1] : vector<32x18xf32> to vector<32xf32>
    %107 = vector.shape_cast %106 : vector<32xf32> to vector<32x1xf32>
    %cst_33 = arith.constant 1.800000e+01 : f32
    %108 = vector.broadcast %cst_33 : f32 to vector<32x1xf32>
    %109 = arith.divf %107, %108 : vector<32x1xf32>
    %110 = vector.broadcast %102 : vector<32x1xf32> to vector<32x18xf32>
    %111 = arith.subf %98, %110 : vector<32x18xf32>
    %cst_34 = arith.constant 9.99999974E-6 : f32
    %112 = vector.broadcast %cst_34 : f32 to vector<32x1xf32>
    %113 = arith.addf %109, %112 : vector<32x1xf32>
    %114 = math.rsqrt %113 : vector<32x1xf32>
    %115 = vector.broadcast %114 : vector<32x1xf32> to vector<32x18xf32>
    %116 = arith.mulf %111, %115 : vector<32x18xf32>
    %117 = vector.broadcast %22 : vector<1x18xf32> to vector<32x18xf32>
    %118 = arith.mulf %116, %117 : vector<32x18xf32>
    %119 = vector.broadcast %23 : vector<1x18xf32> to vector<32x18xf32>
    %120 = arith.addf %118, %119 : vector<32x18xf32>
    %c1 = arith.constant 1 : index
    %c0_35 = arith.constant 0 : index
    %c0_36 = arith.constant 0 : index
    %121 = vector.load %arg3[%c1, %c0_35, %c0_36] : memref<2x32x512xf32, #tpu.memory_space<vmem>>, vector<1x32x512xf32>
    %122 = vector.shape_cast %121 : vector<1x32x512xf32> to vector<32x512xf32>
    %c1_37 = arith.constant 1 : index
    %c0_38 = arith.constant 0 : index
    %c0_39 = arith.constant 0 : index
    %123 = vector.load %arg4[%c1_37, %c0_38, %c0_39] : memref<2x8x128xf32, #tpu.memory_space<vmem>>, vector<1x8x128xf32>
    %124 = vector.shape_cast %123 : vector<1x8x128xf32> to vector<8x128xf32>
    %125 = vector.extract_strided_slice %122 {offsets = [0, 0], sizes = [18, 96], strides = [1, 1]} : vector<32x512xf32> to vector<18x96xf32>
    %126 = vector.extract_strided_slice %122 {offsets = [0, 128], sizes = [18, 32], strides = [1, 1]} : vector<32x512xf32> to vector<18x32xf32>
    %127 = vector.extract_strided_slice %122 {offsets = [0, 256], sizes = [32, 18], strides = [1, 1]} : vector<32x512xf32> to vector<32x18xf32>
    %128 = vector.extract_strided_slice %122 {offsets = [0, 384], sizes = [32, 18], strides = [1, 1]} : vector<32x512xf32> to vector<32x18xf32>
    %129 = vector.extract_strided_slice %124 {offsets = [0, 0], sizes = [1, 96], strides = [1, 1]} : vector<8x128xf32> to vector<1x96xf32>
    %130 = vector.extract_strided_slice %124 {offsets = [1, 0], sizes = [1, 18], strides = [1, 1]} : vector<8x128xf32> to vector<1x18xf32>
    %131 = vector.extract_strided_slice %124 {offsets = [2, 0], sizes = [1, 32], strides = [1, 1]} : vector<8x128xf32> to vector<1x32xf32>
    %132 = vector.extract_strided_slice %124 {offsets = [3, 0], sizes = [1, 18], strides = [1, 1]} : vector<8x128xf32> to vector<1x18xf32>
    %133 = vector.extract_strided_slice %124 {offsets = [4, 0], sizes = [1, 18], strides = [1, 1]} : vector<8x128xf32> to vector<1x18xf32>
    %134 = vector.extract_strided_slice %124 {offsets = [5, 0], sizes = [1, 18], strides = [1, 1]} : vector<8x128xf32> to vector<1x18xf32>
    %135 = vector.extract_strided_slice %124 {offsets = [6, 0], sizes = [1, 18], strides = [1, 1]} : vector<8x128xf32> to vector<1x18xf32>
    %136 = vector.extract_strided_slice %124 {offsets = [7, 0], sizes = [1, 18], strides = [1, 1]} : vector<8x128xf32> to vector<1x18xf32>
    %cst_40 = arith.constant dense<0.000000e+00> : vector<32x96xf32>
    %137 = tpu.matmul %120, %125, %cst_40 {dimension_numbers = #tpu.dot_dimension_numbers<[1], [0], [0], [1], [0, 0, 1, 1], [], []>} : vector<32x18xf32>, vector<18x96xf32>, vector<32x96xf32> -> vector<32x96xf32>
    %138 = vector.broadcast %129 : vector<1x96xf32> to vector<32x96xf32>
    %139 = arith.addf %137, %138 : vector<32x96xf32>
    %140 = vector.shape_cast %139 : vector<32x96xf32> to vector<2x16x96xf32>
    %141 = vector.extract_strided_slice %140 {offsets = [0, 0, 0], sizes = [2, 16, 16], strides = [1, 1, 1]} : vector<2x16x96xf32> to vector<2x16x16xf32>
    %142 = vector.extract_strided_slice %140 {offsets = [0, 0, 32], sizes = [2, 16, 16], strides = [1, 1, 1]} : vector<2x16x96xf32> to vector<2x16x16xf32>
    %143 = vector.extract_strided_slice %140 {offsets = [0, 0, 64], sizes = [2, 16, 16], strides = [1, 1, 1]} : vector<2x16x96xf32> to vector<2x16x16xf32>
    "tpu.trace_start"() <{level = 10 : i32, message = "bld,bmd->blm"}> : () -> ()
    %cst_41 = arith.constant dense<0.000000e+00> : vector<2x16x16xf32>
    %144 = tpu.matmul %141, %142, %cst_41 {dimension_numbers = #tpu.dot_dimension_numbers<[2], [2], [1], [1], [0, 0, 0, 1, 1, 1], [0], [0]>} : vector<2x16x16xf32>, vector<2x16x16xf32>, vector<2x16x16xf32> -> vector<2x16x16xf32>
    "tpu.trace_stop"() : () -> ()
    %cst_42 = arith.constant 0.333333343 : f32
    %145 = vector.broadcast %cst_42 : f32 to vector<2x16x16xf32>
    %146 = arith.mulf %144, %145 : vector<2x16x16xf32>
    %cst_43 = arith.constant dense<0xFF800000> : vector<2x16xf32>
    %147 = vector.multi_reduction <maximumf>, %146, %cst_43 [2] : vector<2x16x16xf32> to vector<2x16xf32>
    %148 = vector.shape_cast %147 : vector<2x16xf32> to vector<2x16x1xf32>
    %149 = vector.broadcast %148 : vector<2x16x1xf32> to vector<2x16x16xf32>
    %150 = arith.subf %146, %149 : vector<2x16x16xf32>
    %151 = math.exp %150 : vector<2x16x16xf32>
    %cst_44 = arith.constant dense<0.000000e+00> : vector<2x16xf32>
    %152 = vector.multi_reduction <add>, %151, %cst_44 [2] : vector<2x16x16xf32> to vector<2x16xf32>
    %153 = vector.shape_cast %152 : vector<2x16xf32> to vector<2x16x1xf32>
    %154 = tpu.reciprocal %153 {approx = true} : vector<2x16x1xf32> -> vector<2x16x1xf32>
    %155 = vector.broadcast %154 : vector<2x16x1xf32> to vector<2x16x16xf32>
    %156 = arith.mulf %151, %155 : vector<2x16x16xf32>
    "tpu.trace_start"() <{level = 10 : i32, message = "blm,bmd->bld"}> : () -> ()
    %cst_45 = arith.constant dense<0.000000e+00> : vector<2x16x16xf32>
    %157 = tpu.matmul %156, %143, %cst_45 {dimension_numbers = #tpu.dot_dimension_numbers<[2], [1], [1], [2], [0, 0, 0, 1, 1, 2], [0], [0]>} : vector<2x16x16xf32>, vector<2x16x16xf32>, vector<2x16x16xf32> -> vector<2x16x16xf32>
    "tpu.trace_stop"() : () -> ()
    %158 = vector.extract_strided_slice %140 {offsets = [0, 0, 16], sizes = [2, 16, 16], strides = [1, 1, 1]} : vector<2x16x96xf32> to vector<2x16x16xf32>
    %159 = vector.extract_strided_slice %140 {offsets = [0, 0, 48], sizes = [2, 16, 16], strides = [1, 1, 1]} : vector<2x16x96xf32> to vector<2x16x16xf32>
    %160 = vector.extract_strided_slice %140 {offsets = [0, 0, 80], sizes = [2, 16, 16], strides = [1, 1, 1]} : vector<2x16x96xf32> to vector<2x16x16xf32>
    "tpu.trace_start"() <{level = 10 : i32, message = "bld,bmd->blm"}> : () -> ()
    %cst_46 = arith.constant dense<0.000000e+00> : vector<2x16x16xf32>
    %161 = tpu.matmul %158, %159, %cst_46 {dimension_numbers = #tpu.dot_dimension_numbers<[2], [2], [1], [1], [0, 0, 0, 1, 1, 1], [0], [0]>} : vector<2x16x16xf32>, vector<2x16x16xf32>, vector<2x16x16xf32> -> vector<2x16x16xf32>
    "tpu.trace_stop"() : () -> ()
    %cst_47 = arith.constant 0.333333343 : f32
    %162 = vector.broadcast %cst_47 : f32 to vector<2x16x16xf32>
    %163 = arith.mulf %161, %162 : vector<2x16x16xf32>
    %cst_48 = arith.constant dense<0xFF800000> : vector<2x16xf32>
    %164 = vector.multi_reduction <maximumf>, %163, %cst_48 [2] : vector<2x16x16xf32> to vector<2x16xf32>
    %165 = vector.shape_cast %164 : vector<2x16xf32> to vector<2x16x1xf32>
    %166 = vector.broadcast %165 : vector<2x16x1xf32> to vector<2x16x16xf32>
    %167 = arith.subf %163, %166 : vector<2x16x16xf32>
    %168 = math.exp %167 : vector<2x16x16xf32>
    %cst_49 = arith.constant dense<0.000000e+00> : vector<2x16xf32>
    %169 = vector.multi_reduction <add>, %168, %cst_49 [2] : vector<2x16x16xf32> to vector<2x16xf32>
    %170 = vector.shape_cast %169 : vector<2x16xf32> to vector<2x16x1xf32>
    %171 = tpu.reciprocal %170 {approx = true} : vector<2x16x1xf32> -> vector<2x16x1xf32>
    %172 = vector.broadcast %171 : vector<2x16x1xf32> to vector<2x16x16xf32>
    %173 = arith.mulf %168, %172 : vector<2x16x16xf32>
    "tpu.trace_start"() <{level = 10 : i32, message = "blm,bmd->bld"}> : () -> ()
    %cst_50 = arith.constant dense<0.000000e+00> : vector<2x16x16xf32>
    %174 = tpu.matmul %173, %160, %cst_50 {dimension_numbers = #tpu.dot_dimension_numbers<[2], [1], [1], [2], [0, 0, 0, 1, 1, 2], [0], [0]>} : vector<2x16x16xf32>, vector<2x16x16xf32>, vector<2x16x16xf32> -> vector<2x16x16xf32>
    "tpu.trace_stop"() : () -> ()
    %175 = tpu.concatenate %157, %174 in 2 : vector<2x16x16xf32>, vector<2x16x16xf32> -> vector<2x16x32xf32>
    %176 = vector.shape_cast %175 : vector<2x16x32xf32> to vector<32x32xf32>
    %cst_51 = arith.constant dense<0.000000e+00> : vector<32x18xf32>
    %177 = tpu.matmul %176, %127, %cst_51 {dimension_numbers = #tpu.dot_dimension_numbers<[1], [0], [0], [1], [0, 0, 1, 1], [], []>} : vector<32x32xf32>, vector<32x18xf32>, vector<32x18xf32> -> vector<32x18xf32>
    %178 = vector.broadcast %130 : vector<1x18xf32> to vector<32x18xf32>
    %179 = arith.addf %177, %178 : vector<32x18xf32>
    %180 = arith.addf %120, %179 : vector<32x18xf32>
    %cst_52 = arith.constant dense<0.000000e+00> : vector<32xf32>
    %181 = vector.multi_reduction <add>, %180, %cst_52 [1] : vector<32x18xf32> to vector<32xf32>
    %182 = vector.shape_cast %181 : vector<32xf32> to vector<32x1xf32>
    %cst_53 = arith.constant 1.800000e+01 : f32
    %183 = vector.broadcast %cst_53 : f32 to vector<32x1xf32>
    %184 = arith.divf %182, %183 : vector<32x1xf32>
    %185 = vector.broadcast %184 : vector<32x1xf32> to vector<32x18xf32>
    %186 = arith.subf %180, %185 : vector<32x18xf32>
    %187 = arith.mulf %186, %186 : vector<32x18xf32>
    %cst_54 = arith.constant dense<0.000000e+00> : vector<32xf32>
    %188 = vector.multi_reduction <add>, %187, %cst_54 [1] : vector<32x18xf32> to vector<32xf32>
    %189 = vector.shape_cast %188 : vector<32xf32> to vector<32x1xf32>
    %cst_55 = arith.constant 1.800000e+01 : f32
    %190 = vector.broadcast %cst_55 : f32 to vector<32x1xf32>
    %191 = arith.divf %189, %190 : vector<32x1xf32>
    %192 = vector.broadcast %184 : vector<32x1xf32> to vector<32x18xf32>
    %193 = arith.subf %180, %192 : vector<32x18xf32>
    %cst_56 = arith.constant 9.99999974E-6 : f32
    %194 = vector.broadcast %cst_56 : f32 to vector<32x1xf32>
    %195 = arith.addf %191, %194 : vector<32x1xf32>
    %196 = math.rsqrt %195 : vector<32x1xf32>
    %197 = vector.broadcast %196 : vector<32x1xf32> to vector<32x18xf32>
    %198 = arith.mulf %193, %197 : vector<32x18xf32>
    %199 = vector.broadcast %133 : vector<1x18xf32> to vector<32x18xf32>
    %200 = arith.mulf %198, %199 : vector<32x18xf32>
    %201 = vector.broadcast %134 : vector<1x18xf32> to vector<32x18xf32>
    %202 = arith.addf %200, %201 : vector<32x18xf32>
    %cst_57 = arith.constant dense<0.000000e+00> : vector<32x32xf32>
    %203 = tpu.matmul %202, %126, %cst_57 {dimension_numbers = #tpu.dot_dimension_numbers<[1], [0], [0], [1], [0, 0, 1, 1], [], []>} : vector<32x18xf32>, vector<18x32xf32>, vector<32x32xf32> -> vector<32x32xf32>
    %204 = vector.broadcast %131 : vector<1x32xf32> to vector<32x32xf32>
    %205 = arith.addf %203, %204 : vector<32x32xf32>
    %cst_58 = arith.constant 0.000000e+00 : f32
    %206 = vector.broadcast %cst_58 : f32 to vector<32x32xf32>
    %207 = arith.maximumf %205, %206 : vector<32x32xf32>
    %cst_59 = arith.constant dense<0.000000e+00> : vector<32x18xf32>
    %208 = tpu.matmul %207, %128, %cst_59 {dimension_numbers = #tpu.dot_dimension_numbers<[1], [0], [0], [1], [0, 0, 1, 1], [], []>} : vector<32x32xf32>, vector<32x18xf32>, vector<32x18xf32> -> vector<32x18xf32>
    %209 = vector.broadcast %132 : vector<1x18xf32> to vector<32x18xf32>
    %210 = arith.addf %208, %209 : vector<32x18xf32>
    %211 = arith.addf %202, %210 : vector<32x18xf32>
    %cst_60 = arith.constant dense<0.000000e+00> : vector<32xf32>
    %212 = vector.multi_reduction <add>, %211, %cst_60 [1] : vector<32x18xf32> to vector<32xf32>
    %213 = vector.shape_cast %212 : vector<32xf32> to vector<32x1xf32>
    %cst_61 = arith.constant 1.800000e+01 : f32
    %214 = vector.broadcast %cst_61 : f32 to vector<32x1xf32>
    %215 = arith.divf %213, %214 : vector<32x1xf32>
    %216 = vector.broadcast %215 : vector<32x1xf32> to vector<32x18xf32>
    %217 = arith.subf %211, %216 : vector<32x18xf32>
    %218 = arith.mulf %217, %217 : vector<32x18xf32>
    %cst_62 = arith.constant dense<0.000000e+00> : vector<32xf32>
    %219 = vector.multi_reduction <add>, %218, %cst_62 [1] : vector<32x18xf32> to vector<32xf32>
    %220 = vector.shape_cast %219 : vector<32xf32> to vector<32x1xf32>
    %cst_63 = arith.constant 1.800000e+01 : f32
    %221 = vector.broadcast %cst_63 : f32 to vector<32x1xf32>
    %222 = arith.divf %220, %221 : vector<32x1xf32>
    %223 = vector.broadcast %215 : vector<32x1xf32> to vector<32x18xf32>
    %224 = arith.subf %211, %223 : vector<32x18xf32>
    %cst_64 = arith.constant 9.99999974E-6 : f32
    %225 = vector.broadcast %cst_64 : f32 to vector<32x1xf32>
    %226 = arith.addf %222, %225 : vector<32x1xf32>
    %227 = math.rsqrt %226 : vector<32x1xf32>
    %228 = vector.broadcast %227 : vector<32x1xf32> to vector<32x18xf32>
    %229 = arith.mulf %224, %228 : vector<32x18xf32>
    %230 = vector.broadcast %135 : vector<1x18xf32> to vector<32x18xf32>
    %231 = arith.mulf %229, %230 : vector<32x18xf32>
    %232 = vector.broadcast %136 : vector<1x18xf32> to vector<32x18xf32>
    %233 = arith.addf %231, %232 : vector<32x18xf32>
    %234 = vector.shape_cast %233 : vector<32x18xf32> to vector<2x16x18xf32>
    %235 = vector.extract_strided_slice %234 {offsets = [0, 0, 0], sizes = [2, 1, 18], strides = [1, 1, 1]} : vector<2x16x18xf32> to vector<2x1x18xf32>
    %236 = vector.shape_cast %235 : vector<2x1x18xf32> to vector<2x18xf32>
    %c0_65 = arith.constant 0 : index
    %c0_66 = arith.constant 0 : index
    %237 = vector.load %arg7[%c0_65, %c0_66] : memref<2x128xf32, #tpu.memory_space<vmem>>, vector<2x128xf32>
    %c0_67 = arith.constant 0 : index
    %c0_68 = arith.constant 0 : index
    %238 = vector.load %arg5[%c0_67, %c0_68] : memref<18x32xf32, #tpu.memory_space<vmem>>, vector<18x32xf32>
    %cst_69 = arith.constant dense<0.000000e+00> : vector<2x32xf32>
    %239 = tpu.matmul %236, %238, %cst_69 {dimension_numbers = #tpu.dot_dimension_numbers<[1], [0], [0], [1], [0, 0, 1, 1], [], []>} : vector<2x18xf32>, vector<18x32xf32>, vector<2x32xf32> -> vector<2x32xf32>
    %240 = vector.extract_strided_slice %237 {offsets = [0, 0], sizes = [1, 32], strides = [1, 1]} : vector<2x128xf32> to vector<1x32xf32>
    %241 = vector.broadcast %240 : vector<1x32xf32> to vector<2x32xf32>
    %242 = arith.addf %239, %241 : vector<2x32xf32>
    %cst_70 = arith.constant 0.000000e+00 : f32
    %243 = vector.broadcast %cst_70 : f32 to vector<2x32xf32>
    %244 = arith.maximumf %242, %243 : vector<2x32xf32>
    %c0_71 = arith.constant 0 : index
    %c0_72 = arith.constant 0 : index
    %245 = vector.load %arg6[%c0_71, %c0_72] : memref<32x128xf32, #tpu.memory_space<vmem>>, vector<32x128xf32>
    %cst_73 = arith.constant dense<0.000000e+00> : vector<2x128xf32>
    %246 = tpu.matmul %244, %245, %cst_73 {dimension_numbers = #tpu.dot_dimension_numbers<[1], [0], [0], [1], [0, 0, 1, 1], [], []>} : vector<2x32xf32>, vector<32x128xf32>, vector<2x128xf32> -> vector<2x128xf32>
    %247 = vector.extract_strided_slice %237 {offsets = [1, 0], sizes = [1, 128], strides = [1, 1]} : vector<2x128xf32> to vector<1x128xf32>
    %248 = vector.broadcast %247 : vector<1x128xf32> to vector<2x128xf32>
    %249 = arith.addf %246, %248 : vector<2x128xf32>
    %c0_74 = arith.constant 0 : index
    %c0_75 = arith.constant 0 : index
    %250 = vector.load %arg8[%c0_74, %c0_75] : memref<2x128xf32, #tpu.memory_space<vmem>>, vector<2x128xf32>
    tpu.vector_store %arg8[%c0_74, %c0_75], %249 {strides = array<i32>} : memref<2x128xf32, #tpu.memory_space<vmem>>, vector<2x128xf32>,
    return
  }
  func.func @transform_0(%arg0: i32) -> (i32, i32, i32) {
    %c0_i32 = arith.constant 0 : i32
    %c0_i32_0 = arith.constant 0 : i32
    %c0_i32_1 = arith.constant 0 : i32
    return %arg0, %c0_i32, %c0_i32_0 : i32, i32, i32
  }
  func.func @transform_1(%arg0: i32) -> (i32, i32) {
    %c0_i32 = arith.constant 0 : i32
    %c0_i32_0 = arith.constant 0 : i32
    %c0_i32_1 = arith.constant 0 : i32
    return %c0_i32, %c0_i32_0 : i32, i32
  }
  func.func @transform_2(%arg0: i32) -> (i32, i32, i32) {
    %c0_i32 = arith.constant 0 : i32
    %c0_i32_0 = arith.constant 0 : i32
    %c0_i32_1 = arith.constant 0 : i32
    %c0_i32_2 = arith.constant 0 : i32
    return %c0_i32, %c0_i32_0, %c0_i32_1 : i32, i32, i32
  }
  func.func @transform_3(%arg0: i32) -> (i32, i32, i32) {
    %c0_i32 = arith.constant 0 : i32
    %c0_i32_0 = arith.constant 0 : i32
    %c0_i32_1 = arith.constant 0 : i32
    %c0_i32_2 = arith.constant 0 : i32
    return %c0_i32, %c0_i32_0, %c0_i32_1 : i32, i32, i32
  }
  func.func @transform_4(%arg0: i32) -> (i32, i32) {
    %c0_i32 = arith.constant 0 : i32
    %c0_i32_0 = arith.constant 0 : i32
    %c0_i32_1 = arith.constant 0 : i32
    return %c0_i32, %c0_i32_0 : i32, i32
  }
  func.func @transform_5(%arg0: i32) -> (i32, i32) {
    %c0_i32 = arith.constant 0 : i32
    %c0_i32_0 = arith.constant 0 : i32
    %c0_i32_1 = arith.constant 0 : i32
    return %c0_i32, %c0_i32_0 : i32, i32
  }
  func.func @transform_6(%arg0: i32) -> (i32, i32) {
    %c0_i32 = arith.constant 0 : i32
    %c0_i32_0 = arith.constant 0 : i32
    %c0_i32_1 = arith.constant 0 : i32
    return %c0_i32, %c0_i32_0 : i32, i32
  }
  func.func @transform_7(%arg0: i32) -> (i32, i32) {
    %c0_i32 = arith.constant 0 : i32
    %c0_i32_0 = arith.constant 0 : i32
    return %arg0, %c0_i32 : i32, i32
  }
}

</mosaic_0001>

<bundles_post_ra>
// kernel: tpu_custom_call.1
= control target key start
LH: loop header
LB: loop body
LE: loop exit
PB: predicated region body
PF: predicated region fallthrough
CT: control target
= control target key end

     0   :  { %12 = vsyncpa [#allocation3], 0  ;;  %s4593_s0 = inlined_call_operand.hbm [shape: f32[2,16,18], index: 0, kind: input, shape index: {}]   ;;  %s4594_s1 = inlined_call_operand.hbm [shape: f32[16,18], index: 1, kind: input, shape index: {}]   ;;  %s4595_s2 = inlined_call_operand.hbm [shape: f32[2,32,512], index: 2, kind: input, shape index: {}]   ;;  %s4596_s3 = inlined_call_operand.hbm [shape: f32[2,8,128], index: 3, kind: input, shape index: {}]   ;;  %s4597_s4 = inlined_call_operand.hbm [shape: f32[18,32], index: 4, kind: input, shape index: {}]   ;;  %s4598_s5 = inlined_call_operand.hbm [shape: f32[32,128], index: 5, kind: input, shape index: {}]   ;;  %s4599_s6 = inlined_call_operand.vmem [shape: f32[2,128], index: 6, kind: input, shape index: {}]   ;;  %s4600_s7 = inlined_call_operand.hbm [shape: f32[2,128], index: 7, kind: output, shape index: {}]  }
   0x1   :  { %13 = vsyncpa [#allocation6], 0 }
   0x2   :  { %14 = vsyncpa [#allocation9], 0 }
   0x3   :  { %15 = vsyncpa [#allocation12], 0 }
   0x4   :  { %16 = vsyncpa [#allocation4], 0  ;;  %s4028_s24 = smov [#allocation5]   ;;  %s4029_s26 = smov [#allocation8]  }
   0x5   :  { %s34_s25 = sshll.u32 %s4028_s24, 4  ;;  %s58_s27 = sshll.u32 %s4029_s26, 4  ;;  %s35_s25 = int_to_ptr.vmem [resolvable:$true] %s34_s25  ;;  %s4088_s27 = int_to_ptr.vmem [resolvable:$true] %s58_s27 }
   0x6   :  { %s3864_s30 = scalar_lea.hbm %s4594_s1, 256 }
   0x7   :  { %p3865_p0 = scmp.ne.s32.totalorder %s4594_s1, %s3864_s30  ;;  %p3868_p1 = scmp.lt.u32.totalorder %s3864_s30, %s4594_s1 }
   0x9   :  { %p3870_p2 = pnand %p3868_p1, %p3865_p0 }
   0xb   :  { %3873 = shalt.err (!%p3870_p2)
}
   0xc   :  { %s3874_s12 = scalar_lea.vmem %s35_s25, 256  ;;  %p3879_p4 = scmp.lt.s32.totalorder %s35_s25, %s35_s25 }
   0xd   :  { %p3875_p3 = scmp.ne.s32.totalorder %s35_s25, %s3874_s12  ;;  %p3880_p5 = scmp.lt.s32.totalorder %s3874_s12, %s3874_s12 }
   0xf   :  { %p3881_p6 = por %p3880_p5, %p3879_p4 }
  0x11   :  { %p3882_p7 = pnand %p3881_p6, %p3875_p3 }
  0x13   :  { %3885 = shalt.err (!%p3882_p7)
}
  0x14   :  { %s4030_s13 = smov 128   ;;  %s4031_s14 = smov 8  }
  0x15   :  { %40 = dma.hbm_to_vmem [thread:$0]  %s4594_s1, 256, %s35_s25, [#allocation6], %s4030_s13, %s4030_s13, %s4031_s14  }
  0x16   :  { %s3886_s19 = scalar_lea.hbm %s4596_s3, 256 }
  0x17   :  { %p3887_p8 = scmp.ne.s32.totalorder %s4596_s3, %s3886_s19  ;;  %p3890_p9 = scmp.lt.u32.totalorder %s3886_s19, %s4596_s3 }
  0x19   :  { %p3892_p10 = pnand %p3890_p9, %p3887_p8 }
  0x1b   :  { %3895 = shalt.err (!%p3892_p10)
}
  0x1c   :  { %s3896_s24 = scalar_lea.vmem %s4088_s27, 256  ;;  %p3901_p12 = scmp.lt.s32.totalorder %s4088_s27, %s4088_s27 }
  0x1d   :  { %p3897_p11 = scmp.ne.s32.totalorder %s4088_s27, %s3896_s24  ;;  %p3902_p13 = scmp.lt.s32.totalorder %s3896_s24, %s3896_s24 }
  0x1f   :  { %p3903_p0 = por %p3902_p13, %p3901_p12 }
  0x21   :  { %p3904_p1 = pnand %p3903_p0, %p3897_p11 }
  0x23   :  { %3907 = shalt.err (!%p3904_p1)
}
  0x24   :  { %64 = dma.hbm_to_vmem [thread:$0]  %s4596_s3, 256, %s4088_s27, [#allocation9], %s4030_s13, %s4030_s13, %s4031_s14  }
  0x25   :  { %s4032_s26 = smov [#allocation2]   ;;  %s4033_s29 = smov [#allocation7]  }
  0x26   :  { %s22_s28 = sshll.u32 %s4032_s26, 4  ;;  %s46_s30 = sshll.u32 %s4033_s29, 4  ;;  %s23_s28 = int_to_ptr.vmem [resolvable:$true] %s22_s28  ;;  %s4125_s30 = int_to_ptr.vmem [resolvable:$true] %s46_s30 }
  0x27   :  { %s3908_s10 = scalar_lea.hbm %s4593_s0, 512 }
  0x28   :  { %p3909_p2 = scmp.ne.s32.totalorder %s4593_s0, %s3908_s10  ;;  %p3912_p3 = scmp.lt.u32.totalorder %s3908_s10, %s4593_s0 }
  0x2a   :  { %p3914_p4 = pnand %p3912_p3, %p3909_p2 }
  0x2c   :  { %3917 = shalt.err (!%p3914_p4)
}
  0x2d   :  { %s3918_s3 = scalar_lea.vmem %s23_s28, 512  ;;  %p3923_p6 = scmp.lt.s32.totalorder %s23_s28, %s23_s28 }
  0x2e   :  { %p3919_p5 = scmp.ne.s32.totalorder %s23_s28, %s3918_s3  ;;  %p3924_p7 = scmp.lt.s32.totalorder %s3918_s3, %s3918_s3 }
  0x30   :  { %p3925_p8 = por %p3924_p7, %p3923_p6 }
  0x32   :  { %p3926_p9 = pnand %p3925_p8, %p3919_p5 }
  0x34   :  { %3929 = shalt.err (!%p3926_p9)
}
  0x35   :  { %28 = dma.hbm_to_vmem [thread:$0]  %s4593_s0, 512, %s23_s28, [#allocation3], %s4030_s13, %s4030_s13, %s4031_s14  }
  0x36   :  { %s3930_s20 = scalar_lea.hbm %s4595_s2, 4096 }
  0x37   :  { %p3931_p10 = scmp.ne.s32.totalorder %s4595_s2, %s3930_s20  ;;  %p3934_p11 = scmp.lt.u32.totalorder %s3930_s20, %s4595_s2 }
  0x39   :  { %p3936_p12 = pnand %p3934_p11, %p3931_p10 }
  0x3b   :  { %3939 = shalt.err (!%p3936_p12)
}
  0x3c   :  { %s3940_s1 = scalar_lea.vmem %s4125_s30, 4096  ;;  %p3945_p0 = scmp.lt.s32.totalorder %s4125_s30, %s4125_s30 }
  0x3d   :  { %p3941_p13 = scmp.ne.s32.totalorder %s4125_s30, %s3940_s1  ;;  %p3946_p1 = scmp.lt.s32.totalorder %s3940_s1, %s3940_s1 }
  0x3f   :  { %p3947_p2 = por %p3946_p1, %p3945_p0 }
  0x41   :  { %p3948_p3 = pnand %p3947_p2, %p3941_p13 }
  0x43   :  { %3951 = shalt.err (!%p3948_p3)
}
  0x44   :  { %s4034_s0 = smov 512   ;;  %s4035_s25 = smov 32  }
  0x45   :  { %52 = dma.hbm_to_vmem [thread:$0]  %s4595_s2, 4096, %s4125_s30, [#allocation6], %s4034_s0, %s4034_s0, %s4035_s25  }
  0x46   :  { %s4036_s29 = smov [#allocation10]   ;;  %s4037_s9 = smov [#allocation11]  }
  0x47   :  { %s70_s8 = sshll.u32 %s4036_s29, 4  ;;  %s82_s10 = sshll.u32 %s4037_s9, 4  ;;  %s71_s8 = int_to_ptr.vmem [resolvable:$true] %s70_s8  ;;  %s4159_s10 = int_to_ptr.vmem [resolvable:$true] %s82_s10 }
  0x48   :  { %s3952_s15 = scalar_lea.hbm %s4597_s4, 384 }
  0x49   :  { %p3953_p4 = scmp.ne.s32.totalorder %s4597_s4, %s3952_s15  ;;  %p3956_p5 = scmp.lt.u32.totalorder %s3952_s15, %s4597_s4 }
  0x4b   :  { %p3958_p6 = pnand %p3956_p5, %p3953_p4 }
  0x4d   :  { %3961 = shalt.err (!%p3958_p6)
}
  0x4e   :  { %s3962_s2 = scalar_lea.vmem %s71_s8, 384  ;;  %p3967_p8 = scmp.lt.s32.totalorder %s71_s8, %s71_s8 }
  0x4f   :  { %p3963_p7 = scmp.ne.s32.totalorder %s71_s8, %s3962_s2  ;;  %p3968_p9 = scmp.lt.s32.totalorder %s3962_s2, %s3962_s2 }
  0x51   :  { %p3969_p10 = por %p3968_p9, %p3967_p8 }
  0x53   :  { %p3970_p11 = pnand %p3969_p10, %p3963_p7 }
  0x55   :  { %3973 = shalt.err (!%p3970_p11)
}
  0x56   :  { %76 = dma.hbm_to_vmem [thread:$0]  %s4597_s4, 384, %s71_s8, [#allocation9], %s4030_s13, %s4030_s13, %s4031_s14  }
  0x57   :  { %s3974_s21 = scalar_lea.hbm %s4598_s5, 512 }
  0x58   :  { %p3975_p12 = scmp.ne.s32.totalorder %s4598_s5, %s3974_s21  ;;  %p3978_p13 = scmp.lt.u32.totalorder %s3974_s21, %s4598_s5 }
  0x5a   :  { %p3980_p0 = pnand %p3978_p13, %p3975_p12 }
  0x5c   :  { %3983 = shalt.err (!%p3980_p0)
}
  0x5d   :  { %s3984_s0 = scalar_lea.vmem %s4159_s10, 512  ;;  %p3989_p2 = scmp.lt.s32.totalorder %s4159_s10, %s4159_s10 }
  0x5e   :  { %p3985_p1 = scmp.ne.s32.totalorder %s4159_s10, %s3984_s0  ;;  %p3990_p3 = scmp.lt.s32.totalorder %s3984_s0, %s3984_s0 }
  0x60   :  { %p3991_p4 = por %p3990_p3, %p3989_p2 }
  0x62   :  { %p3992_p5 = pnand %p3991_p4, %p3985_p1 }
  0x64   :  { %3995 = shalt.err (!%p3992_p5)
}
  0x65   :  { %88 = dma.hbm_to_vmem [thread:$0]  %s4598_s5, 512, %s4159_s10, [#allocation12], %s4030_s13, %s4030_s13, %s4031_s14  }
  0x66   :  { %4018 = dma.done.wait [#allocation3], 512  }
  0x67   :  { %4019 = vsyncadd [#allocation3], 4294966784 }
  0x68   :  { %4020 = dma.done.wait [#allocation6], 4352  }
  0x69   :  { %4021 = vsyncadd [#allocation6], 4294962944 }
  0x6a   :  { %4022 = dma.done.wait [#allocation9], 640  }
  0x6b   :  { %4023 = vsyncadd [#allocation9], 4294966656 }
  0x6c   :  { %4024 = dma.done.wait [#allocation12], 512  }
  0x6d   :  { %4025 = vsyncadd [#allocation12], 4294966784  ;;  %v123_v0 = vld [vmem:[#allocation7] sm:$0xff]  ;;  %vm155_vm0 = vcmask 1041408   ;;  %v109_v4 = vld [vmem:[#allocation2] sm:$0xff]  ;;  %vm142_vm1 = vcmask 146432   ;;  %v138_v18 = vlaneseq }
  0x6e   :  { %v127_v1 = vld [vmem:[#allocation7 + $0x20] sm:$0xff]  ;;  %v117_v6 = vld [vmem:[#allocation5] sm:$0xff]  ;;  %v113_v7 = vmul.f32 4.2426405, %v109_v4  ;;  %v110_v9 = vld [vmem:[#allocation2 + $0x8] sm:$0xff]  ;;  %vm250_vm2 = vcmask 130048  }
  0x6f   :  { %v131_v2 = vld [vmem:[#allocation7 + $0x40] sm:$0xff]  ;;  %v3535_v3 = vpack.c.bf16 %v127_v1, %v123_v0  ;;  %v118_v10 = vld [vmem:[#allocation5 + $0x8] sm:$0xff]  ;;  %v114_v11 = vmul.f32 4.2426405, %v110_v9  ;;  %v112_v12 = vld [vmem:[#allocation2 + $0x18] sm:$0xff]  ;;  %v4214_v19 = vshrl.u32 %v138_v18, 7 }
  0x70   :  { %v111_v5 = vld [vmem:[#allocation2 + $0x10] sm:$0xff]  ;;  %v4196_v13 = vadd.f32 %v117_v6, %v113_v7  ;;  %v116_v15 = vmul.f32 4.2426405, %v112_v12  ;;  %s4038_s5 = smov 96   ;;  %vm4238_vm3 = vmpackc.low %vm250_vm2, %vm250_vm2  ;;  %s4039_s13 = smov 64   ;;  %vm1073_vm4 = vcmask 261120  }
  0x71   :  { %v115_v8 = vmul.f32 4.2426405, %v111_v5  ;;  %3536 = vmatprep.subr.bf16.mxu0 %v3535_v3  ;;  %v4199_v14 = vadd.f32 %v118_v10, %v114_v11  ;;  %v4217_v20 = vsub.s32 0, %v4214_v19  ;;  %v4219_v21 = vld [vmem:[#allocation8] sm:$0xff]  ;;  %s4040_s14 = smov 80   ;;  %s4041_s26 = smov 112  }
  0x72   :  { %3538 = vmatpush3.bf16.msra.mxu0 %v3535_v3  ;;  %3305 = vmatprep.mubr.msk.f32.mxu0 %vm142_vm1, %v4196_v13  ;;  %v4208_v17 = vadd.f32 %v118_v10, %v116_v15  ;;  %s4042_s28 = smov 48   ;;  %s4043_s29 = smov 16   ;;  %vm4045_vm5 = vmmov 0   ;;  %vm2901_vm6 = vcmask 1041409  }
  0x73   :  { %3303 = vmatprep.subr.msk.mxu0 %vm155_vm0, %v131_v2  ;;  %v4201_v16 = vadd.f32 %v117_v6, %v115_v8  ;;  %v141_v22 = vrot.slane %v4219_v21, %v4217_v20  ;;  %s4047_s10 = smov [#allocation13]  }
  0x74   :  { %s3067_s11 = sshll.u32 %s4047_s10, 4  ;;  %s3068_s11 = int_to_ptr.vmem [resolvable:$true] %s3067_s11 }
  0x75   :  { %s3996_s12 = scalar_lea.vmem %s3068_s11, 32  ;;  %p4001_p7 = scmp.lt.s32.totalorder %s3068_s11, %s3068_s11 }
  0x76   :  { %3304 = vmatpush3.msk.msra.mxu0 %vm155_vm0, %v131_v2  ;;  %p3997_p6 = scmp.ne.s32.totalorder %s3068_s11, %s3996_s12  ;;  %p4002_p8 = scmp.lt.s32.totalorder %s3996_s12, %s3996_s12 }
  0x77   :  { %3306 = vmatmul.mubr.msk.f32.vlgmr.msra.gmra.mrb[0].mxu0 %vm142_vm1, %v4199_v14 }
  0x78   :  { %3308 = vmatprep.mubr.msk.f32.mxu0 %vm142_vm1, %v4201_v16  ;;  %p4003_p9 = por %p4002_p8, %p4001_p7 }
  0x7a   :  { %p4004_p10 = pnand %p4003_p9, %p3997_p6 }
  0x7b   :  { %3309 = vmatmul.mubr.msk.f32.gmra.mrb[2].mxu0 %vm142_vm1, %v4208_v17 }
 0x14a   :  { %v3307_v23 = vpop.f32.mrb[0].mxu0 }
 0x14b   :  { %v231_v24 = vadd.f32 %v3307_v23, %v141_v22  ;;  %v225_v25 = vpop.f32.mrb[1].mxu0 }
 0x14c   :  { %v226_v26 = vadd.f32 %v225_v25, %v141_v22 }
 0x14e   :  { %v3310_v27 = vpop.f32.mrb[2].mxu0  ;;  %3315 = vmatprep.mubr.msk.f32.mxu1 %vm250_vm2, %v226_v26  ;;  %v4224_v28 = vpack.i.bf16 %v231_v24, %v226_v26 }
 0x14f   :  { %v4226_v29 = vadd.f32 %v3310_v27, %v141_v22  ;;  %v235_v30 = vpop.f32.mrb[3].mxu0 }
 0x150   :  { %v236_v31 = vadd.f32 %v235_v30, %v141_v22  ;;  %3693 = vrot.lane.b32.xlu0 %v4224_v28, %s4038_s5 }
 0x152   :  { %v4231_v32 = vpack.i.bf16 %v4226_v29, %v236_v31  ;;  %3322 = vmatprep.mubr.msk.f32.mxu0 %vm250_vm2, %v236_v31 }
 0x154   :  { %3698 = vrot.lane.b32.xlu0 %v4231_v32, %s4038_s5 }
 0x1c2   :  { %v3694_v33 = vpop.permute.xlu0 %3693 }
 0x1c3   :  { %v3696_v34 = vunpack.i.h.bf16 %v3694_v33  ;;  %v3695_v35 = vunpack.i.l.bf16 %v3694_v33 }
 0x1c5   :  { %v3539_v37 = vpack.c.bf16 %v3696_v34, %v3695_v35 }
 0x1c6   :  { %v3699_v38 = vpop.permute.xlu0 %3698 }
 0x1c7   :  { %v3701_v39 = vunpack.i.h.bf16 %v3699_v38  ;;  %v3700_v40 = vunpack.i.l.bf16 %v3699_v38  ;;  %3541 = vmatprep.subr.msk.bf16.mxu1 %vm4238_vm3, %v3539_v37 }
 0x1c8   :  { %3544 = vmatpush3.bf16.xpose.msk.msra.mxu1 %vm4238_vm3, %v3539_v37 }
 0x1c9   :  { %v3545_v41 = vpack.c.bf16 %v3701_v39, %v3700_v40 }
 0x1cb   :  { %3547 = vmatprep.subr.msk.bf16.mxu0 %vm4238_vm3, %v3545_v41 }
 0x1cc   :  { %3550 = vmatpush3.bf16.xpose.msk.msra.mxu0 %vm4238_vm3, %v3545_v41 }
 0x1cf   :  { %3316 = vmatmul.mubr.msk.f32.vlgmr.msra.gmra.mrb[0].mxu1 %vm250_vm2, %v231_v24 }
 0x1d3   :  { %3323 = vmatmul.mubr.msk.f32.vlgmr.msra.gmra.mrb[4].mxu0 %vm250_vm2, %v4226_v29 }
 0x2a2   :  { %v3317_v42 = vpop.f32.mrb[0].mxu1 }
 0x2a3   :  { %v325_v43 = vpop.f32.mrb[1].mxu1  ;;  %v424_v45 = vmul.f32 0.33333334, %v3317_v42 }
 0x2a4   :  { %v423_v44 = vmul.f32 0.33333334, %v325_v43 }
 0x2a5   :  { %v430_v52 = vsel %vm250_vm2, %v424_v45, -inf }
 0x2a6   :  { %v3324_v46 = vpop.f32.mrb[4].mxu0  ;;  %v427_v47 = vsel %vm250_vm2, %v423_v44, -inf }
 0x2a7   :  { %v414_v48 = vpop.f32.mrb[5].mxu0  ;;  %428 = vmax.xlane.f32.xlu1 %v427_v47  ;;  %v426_v50 = vmul.f32 0.33333334, %v3324_v46 }
 0x2a8   :  { %v425_v49 = vmul.f32 0.33333334, %v414_v48 }
 0x2a9   :  { %v436_v53 = vsel %vm250_vm2, %v426_v50, -inf }
 0x2aa   :  { %v433_v51 = vsel %vm250_vm2, %v425_v49, -inf }
 0x2ab   :  { %434 = vmax.xlane.f32.xlu0 %v433_v51  ;;  %431 = vmax.xlane.f32.xlu1 %v430_v52 }
 0x2af   :  { %437 = vmax.xlane.f32.xlu1 %v436_v53 }
 0x2c0   :  { %3703 = vrot.lane.b32.xlu1 %v4224_v28, %s4039_s13 }
 0x2c1   :  { %3708 = vrot.lane.b32.xlu0 %v4231_v32, %s4039_s13 }
 0x2c4   :  { %3713 = vrot.lane.b32.xlu1 %v4224_v28, %s4040_s14 }
 0x2c5   :  { %736 = vrot.lane.b32.xlu0 %v236_v31, %s4041_s26 }
 0x2c8   :  { %3718 = vrot.lane.b32.xlu1 %v4231_v32, %s4040_s14 }
 0x2cc   :  { %645 = vrot.lane.b32.xlu1 %v226_v26, %s4041_s26 }
 0x2d0   :  { %647 = vrot.lane.b32.xlu1 %v231_v24, %s4041_s26 }
 0x334   :  { %v429_v54 = vpop.xlane.xlu1 %428 }
 0x335   :  { %v439_v55 = vsub.f32 %v423_v44, %v429_v54 }
 0x337   :  { %v443_v60 = vmul.f32 1.442695, %v439_v55 }
 0x338   :  { %v435_v56 = vpop.xlane.xlu0 %434  ;;  %v432_v57 = vpop.xlane.xlu1 %431 }
 0x339   :  { %v440_v58 = vsub.f32 %v424_v45, %v432_v57  ;;  %v441_v3 = vsub.f32 %v425_v49, %v435_v56 }
 0x33b   :  { %v445_v59 = vmul.f32 1.442695, %v440_v58  ;;  %v447_v9 = vmul.f32 1.442695, %v441_v3 }
 0x33c   :  { %v3709_v61 = vpop.permute.xlu0 %3708  ;;  %v438_v62 = vpop.xlane.xlu1 %437 }
 0x33d   :  { %v3711_v63 = vunpack.i.h.bf16 %v3709_v61  ;;  %v3710_v0 = vunpack.i.l.bf16 %v3709_v61  ;;  %v442_v1 = vsub.f32 %v426_v50, %v438_v62  ;;  %3772 = vpow2.f32 %v445_v59 }
 0x33e   :  { %3774 = vpow2.f32 %v443_v60 }
 0x33f   :  { %v3555_v2 = vpack.c.bf16 %v3711_v63, %v3710_v0  ;;  %v449_v4 = vmul.f32 1.442695, %v442_v1 }
 0x340   :  { %v3704_v5 = vpop.permute.xlu1 %3703  ;;  %v737_v50 = vpop.permute.xlu0 %736 }
 0x341   :  { %v3706_v6 = vunpack.i.h.bf16 %v3704_v5  ;;  %v3705_v7 = vunpack.i.l.bf16 %v3704_v5  ;;  %3556 = vmatprep.subr.bf16.mxu1 %v3555_v2  ;;  %3776 = vpow2.f32 %v449_v4 }
 0x342   :  { %3558 = vmatpush3.bf16.msra.mxu1 %v3555_v2  ;;  %3778 = vpow2.f32 %v447_v9 }
 0x343   :  { %v3551_v8 = vpack.c.bf16 %v3706_v6, %v3705_v7 }
 0x344   :  { %v3714_v10 = vpop.permute.xlu1 %3713 }
 0x345   :  { %v3716_v11 = vunpack.i.h.bf16 %v3714_v10  ;;  %v3715_v12 = vunpack.i.l.bf16 %v3714_v10  ;;  %3552 = vmatprep.subr.bf16.mxu0 %v3551_v8 }
 0x346   :  { %3554 = vmatpush3.bf16.msra.mxu0 %v3551_v8 }
 0x347   :  { %v3559_v15 = vpack.c.bf16 %v3716_v11, %v3715_v12  ;;  %v3773_v18 = vpop.eup %3772 }
 0x348   :  { %v3719_v22 = vpop.permute.xlu1 %3718  ;;  %v454_v25 = vsel %vm250_vm2, %v3773_v18, 0.0  ;;  %v3775_v26 = vpop.eup %3774 }
 0x349   :  { %v3721_v23 = vunpack.i.h.bf16 %v3719_v22  ;;  %v3720_v24 = vunpack.i.l.bf16 %v3719_v22  ;;  %3561 = vmatprep.subr.msk.bf16.mxu0 %vm4238_vm3, %v3559_v15  ;;  %455 = vadd.xlane.f32.xlu1 %v454_v25  ;;  %v451_v30 = vsel %vm250_vm2, %v3775_v26, 0.0 }
 0x34b   :  { %v3565_v27 = vpack.c.bf16 %v3721_v23, %v3720_v24  ;;  %v3777_v31 = vpop.eup %3776 }
 0x34c   :  { %v460_v33 = vsel %vm250_vm2, %v3777_v31, 0.0  ;;  %v3779_v34 = vpop.eup %3778  ;;  %v646_v37 = vpop.permute.xlu1 %645 }
 0x34d   :  { %3567 = vmatprep.subr.msk.bf16.mxu1 %vm4238_vm3, %v3565_v27  ;;  %452 = vadd.xlane.f32.xlu1 %v451_v30  ;;  %v457_v35 = vsel %vm250_vm2, %v3779_v34, 0.0 }
 0x350   :  { %v648_v38 = vpop.permute.xlu1 %647 }
 0x351   :  { %461 = vadd.xlane.f32.xlu1 %v460_v33 }
 0x355   :  { %458 = vadd.xlane.f32.xlu1 %v457_v35 }
 0x366   :  { %738 = vrot.lane.b32.xlu1 %v4226_v29, %s4041_s26 }
 0x3d6   :  { %v456_v39 = vpop.xlane.xlu1 %455 }
 0x3d7   :  { %3780 = vrcp.f32 %v456_v39 }
 0x3da   :  { %v453_v40 = vpop.xlane.xlu1 %452 }
 0x3db   :  { %3782 = vrcp.f32 %v453_v40 }
 0x3de   :  { %v462_v41 = vpop.xlane.xlu1 %461 }
 0x3df   :  { %3784 = vrcp.f32 %v462_v41 }
 0x3e1   :  { %v3781_v43 = vpop.eup %3780 }
 0x3e2   :  { %v459_v42 = vpop.xlane.xlu1 %458  ;;  %v468_v46 = vmul.f32 %v3781_v43, %v3773_v18 }
 0x3e3   :  { %3786 = vrcp.f32 %v459_v42 }
 0x3e5   :  { %v3783_v44 = vpop.eup %3782 }
 0x3e6   :  { %v467_v45 = vmul.f32 %v3783_v44, %v3775_v26  ;;  %v739_v51 = vpop.permute.xlu1 %738 }
 0x3e8   :  { %3329 = vmatprep.mubr.msk.f32.mxu0 %vm250_vm2, %v467_v45 }
 0x3e9   :  { %3330 = vmatmul.mubr.msk.f32.vlgmr.msra.gmra.mrb[6].mxu0 %vm250_vm2, %v468_v46  ;;  %v3785_v29 = vpop.eup %3784 }
 0x3ea   :  { %3564 = vmatpush3.bf16.xpose.msk.msra.mxu0 %vm4238_vm3, %v3559_v15  ;;  %3343 = vmatprep.mubr.msk.f32.mxu0 %vm250_vm2, %v646_v37  ;;  %v470_v49 = vmul.f32 %v3785_v29, %v3777_v31 }
 0x3ed   :  { %v3787_v47 = vpop.eup %3786 }
 0x3ee   :  { %v469_v48 = vmul.f32 %v3787_v47, %v3779_v34 }
 0x3f0   :  { %3336 = vmatprep.mubr.msk.f32.mxu1 %vm250_vm2, %v469_v48 }
 0x3f1   :  { %3344 = vmatmul.mubr.msk.f32.vlgmr.msra.gmra.mrb[8].mxu0 %vm250_vm2, %v648_v38  ;;  %3337 = vmatmul.mubr.msk.f32.vlgmr.msra.gmra.mrb[2].mxu1 %vm250_vm2, %v470_v49 }
 0x3f2   :  { %3570 = vmatpush3.bf16.xpose.msk.msra.mxu1 %vm4238_vm3, %v3565_v27  ;;  %3350 = vmatprep.mubr.msk.f32.mxu1 %vm250_vm2, %v737_v50 }
 0x3f9   :  { %3351 = vmatmul.mubr.msk.f32.vlgmr.msra.gmra.mrb[4].mxu1 %vm250_vm2, %v739_v51 }
 0x4bc   :  { %v4290_v52 = vpop.f32.mrb[6].mxu0 }
 0x4bd   :  { %v4292_v53 = vpop.f32.mrb[7].mxu0 }
 0x4c4   :  { %v3345_v54 = vpop.f32.mrb[8].mxu0  ;;  %v4294_v55 = vpop.f32.mrb[2].mxu1 }
 0x4c5   :  { %v828_v56 = vmul.f32 0.33333334, %v3345_v54  ;;  %v727_v57 = vpop.f32.mrb[9].mxu0  ;;  %v4296_v58 = vpop.f32.mrb[3].mxu1  ;;  %v125_v54 = vld [vmem:[#allocation7 + $0x10] sm:$0xff] }
 0x4c6   :  { %v827_v59 = vmul.f32 0.33333334, %v727_v57 }
 0x4c7   :  { %v834_v60 = vsel %vm250_vm2, %v828_v56, -inf }
 0x4c8   :  { %835 = vmax.xlane.f32.xlu1 %v834_v60  ;;  %v831_v61 = vsel %vm250_vm2, %v827_v59, -inf  ;;  %v135_v60 = vld [vmem:[#allocation7 + $0x70] sm:$0xff] }
 0x4c9   :  { %832 = vmax.xlane.f32.xlu0 %v831_v61 }
 0x4cc   :  { %v3352_v62 = vpop.f32.mrb[4].mxu1 }
 0x4cd   :  { %v818_v63 = vpop.f32.mrb[5].mxu1  ;;  %v830_v1 = vmul.f32 0.33333334, %v3352_v62 }
 0x4ce   :  { %v829_v0 = vmul.f32 0.33333334, %v818_v63 }
 0x4cf   :  { %v840_v3 = vsel %vm250_vm2, %v830_v1, -inf }
 0x4d0   :  { %v837_v2 = vsel %vm250_vm2, %v829_v0, -inf }
 0x4d1   :  { %838 = vmax.xlane.f32.xlu0 %v837_v2 }
 0x4d5   :  { %841 = vmax.xlane.f32.xlu0 %v840_v3 }
 0x555   :  { %v836_v4 = vpop.xlane.xlu1 %835 }
 0x556   :  { %v844_v5 = vsub.f32 %v828_v56, %v836_v4  ;;  %v833_v6 = vpop.xlane.xlu0 %832  ;;  %v129_v56 = vld [vmem:[#allocation7 + $0x30] sm:$0xff] }
 0x557   :  { %v843_v7 = vsub.f32 %v827_v59, %v833_v6  ;;  %v3579_v57 = vpack.c.bf16 %v129_v56, %v125_v54  ;;  %v133_v59 = vld [vmem:[#allocation7 + $0x50] sm:$0xff]  ;;  %v126_v54 = vld [vmem:[#allocation7 + $0x18] sm:$0xff] }
 0x558   :  { %v849_v8 = vmul.f32 1.442695, %v844_v5  ;;  %v3583_v61 = vpack.c.bf16 %v135_v60, %v133_v59  ;;  %v130_v56 = vld [vmem:[#allocation7 + $0x38] sm:$0xff] }
 0x559   :  { %v847_v9 = vmul.f32 1.442695, %v843_v7 }
 0x55a   :  { %3788 = vpow2.f32 %v849_v8 }
 0x55b   :  { %3790 = vpow2.f32 %v847_v9 }
 0x55e   :  { %v839_v10 = vpop.xlane.xlu0 %838 }
 0x55f   :  { %v845_v11 = vsub.f32 %v829_v0, %v839_v10 }
 0x561   :  { %v851_v12 = vmul.f32 1.442695, %v845_v11 }
 0x562   :  { %v842_v15 = vpop.xlane.xlu0 %841 }
 0x563   :  { %3792 = vpow2.f32 %v851_v12  ;;  %v846_v18 = vsub.f32 %v830_v1, %v842_v15 }
 0x564   :  { %v3789_v22 = vpop.eup %3788 }
 0x565   :  { %v3791_v23 = vpop.eup %3790  ;;  %v853_v24 = vmul.f32 1.442695, %v846_v18  ;;  %v858_v25 = vsel %vm250_vm2, %v3789_v22, 0.0 }
 0x566   :  { %859 = vadd.xlane.f32.xlu0 %v858_v25  ;;  %v855_v26 = vsel %vm250_vm2, %v3791_v23, 0.0 }
 0x567   :  { %3794 = vpow2.f32 %v853_v24  ;;  %856 = vadd.xlane.f32.xlu1 %v855_v26 }
 0x56d   :  { %v3793_v27 = vpop.eup %3792 }
 0x56e   :  { %v861_v30 = vsel %vm250_vm2, %v3793_v27, 0.0 }
 0x56f   :  { %862 = vadd.xlane.f32.xlu1 %v861_v30 }
 0x571   :  { %v3795_v31 = vpop.eup %3794 }
 0x572   :  { %v864_v33 = vsel %vm250_vm2, %v3795_v31, 0.0 }
 0x573   :  { %865 = vadd.xlane.f32.xlu0 %v864_v33 }
 0x580   :  { %3723 = vrot.lane.b32.xlu1 %v4224_v28, %s4042_s28 }
 0x589   :  { %3728 = vrot.lane.b32.xlu0 %v4231_v32, %s4042_s28 }
 0x5f3   :  { %v860_v35 = vpop.xlane.xlu0 %859 }
 0x5f4   :  { %v857_v34 = vpop.xlane.xlu1 %856 }
 0x5f5   :  { %3796 = vrcp.f32 %v857_v34 }
 0x5f6   :  { %3798 = vrcp.f32 %v860_v35 }
 0x5fc   :  { %v863_v37 = vpop.xlane.xlu1 %862 }
 0x5fd   :  { %3800 = vrcp.f32 %v863_v37 }
 0x5ff   :  { %v3797_v38 = vpop.eup %3796 }
 0x600   :  { %v3724_v39 = vpop.permute.xlu1 %3723  ;;  %v866_v40 = vpop.xlane.xlu0 %865  ;;  %v871_v41 = vmul.f32 %v3797_v38, %v3791_v23 }
 0x601   :  { %v3726_v42 = vunpack.i.h.bf16 %v3724_v39  ;;  %v3725_v43 = vunpack.i.l.bf16 %v3724_v39  ;;  %3802 = vrcp.f32 %v866_v40  ;;  %v3799_v28 = vpop.eup %3798 }
 0x602   :  { %3357 = vmatprep.mubr.msk.f32.mxu0 %vm250_vm2, %v871_v41  ;;  %v872_v47 = vmul.f32 %v3799_v28, %v3789_v22 }
 0x603   :  { %v3571_v44 = vpack.c.bf16 %v3726_v42, %v3725_v43 }
 0x604   :  { %v3729_v45 = vpop.permute.xlu0 %3728 }
 0x605   :  { %v3731_v46 = vunpack.i.h.bf16 %v3729_v45  ;;  %v3730_v32 = vunpack.i.l.bf16 %v3729_v45  ;;  %3572 = vmatprep.subr.bf16.mxu0 %v3571_v44 }
 0x606   :  { %3574 = vmatpush3.bf16.msra.mxu0 %v3571_v44 }
 0x607   :  { %v3801_v29 = vpop.eup %3800  ;;  %v3575_v48 = vpack.c.bf16 %v3731_v46, %v3730_v32  ;;  %3580 = vmatprep.subr.bf16.mxu0 %v3579_v57 }
 0x608   :  { %v873_v49 = vmul.f32 %v3801_v29, %v3793_v27 }
 0x609   :  { %3358 = vmatmul.mubr.msk.f32.vlgmr.msra.gmra.mrb[10].mxu0 %vm250_vm2, %v872_v47  ;;  %3576 = vmatprep.subr.bf16.mxu1 %v3575_v48 }
 0x60a   :  { %3578 = vmatpush3.bf16.msra.mxu1 %v3575_v48  ;;  %3364 = vmatprep.mubr.msk.f32.mxu1 %vm250_vm2, %v873_v49  ;;  %v124_v48 = vld [vmem:[#allocation7 + $0x8] sm:$0xff] }
 0x60b   :  { %v3803_v50 = vpop.eup %3802  ;;  %3582 = vmatpush3.bf16.msra.mxu0 %v3579_v57  ;;  %v128_v49 = vld [vmem:[#allocation7 + $0x28] sm:$0xff]  ;;  %v3591_v57 = vpack.c.bf16 %v130_v56, %v126_v54 }
 0x60c   :  { %v874_v51 = vmul.f32 %v3803_v50, %v3795_v31  ;;  %3584 = vmatprep.subr.bf16.mxu0 %v3583_v61  ;;  %v3587_v50 = vpack.c.bf16 %v128_v49, %v124_v48 }
 0x60e   :  { %3365 = vmatmul.mubr.msk.f32.vlgmr.msra.gmra.mrb[6].mxu1 %vm250_vm2, %v874_v51  ;;  %v132_v51 = vld [vmem:[#allocation7 + $0x48] sm:$0xff]  ;;  %3588 = vmatprep.subr.bf16.mxu1 %v3587_v50 }
 0x60f   :  { %3586 = vmatpush3.bf16.msra.mxu0 %v3583_v61  ;;  %3590 = vmatpush3.bf16.msra.mxu1 %v3587_v50 }
 0x610   :  { %3385 = vmatprep.subr.msk.mxu1 %vm155_vm0, %v132_v51  ;;  %3592 = vmatprep.subr.bf16.mxu0 %v3591_v57 }
 0x613   :  { %3386 = vmatpush3.msk.msra.mxu1 %vm155_vm0, %v132_v51 }
 0x6dc   :  { %v3359_v62 = vpop.f32.mrb[10].mxu0 }
 0x6dd   :  { %v953_v63 = vpop.f32.mrb[11].mxu0 }
 0x6de   :  { %1053 = vrot.lane.b32.xlu1 %v953_v63, %s4043_s29 }
 0x6e1   :  { %v3366_v0 = vpop.f32.mrb[6].mxu1 }
 0x6e2   :  { %1055 = vrot.lane.b32.xlu1 %v3359_v62, %s4043_s29  ;;  %v1040_v1 = vpop.f32.mrb[7].mxu1 }
 0x6e3   :  { %1057 = vrot.lane.b32.xlu0 %v1040_v1, %s4043_s29 }
 0x6e6   :  { %1059 = vrot.lane.b32.xlu1 %v3366_v0, %s4043_s29 }
 0x750   :  { %v1054_v2 = vpop.permute.xlu1 %1053 }
 0x751   :  { %v1065_v3 = vsel %vm250_vm2, %v4292_v53, %v1054_v2  ;;  %v4331_v53 = vsub.s32 1, %v4214_v19 }
 0x752   :  { %3375 = vmatprep.mubr.msk.f32.mxu0 %vm1073_vm4, %v1065_v3 }
 0x754   :  { %v1056_v4 = vpop.permute.xlu1 %1055 }
 0x755   :  { %v1066_v5 = vsel %vm250_vm2, %v4290_v52, %v1056_v4  ;;  %v1058_v6 = vpop.permute.xlu0 %1057  ;;  %v1072_v52 = vrot.slane %v4219_v21, %v4331_v53 }
 0x756   :  { %v1067_v7 = vsel %vm250_vm2, %v4296_v58, %v1058_v6  ;;  %3376 = vmatmul.mubr.msk.f32.vlgmr.msra.gmra.mrb[12].mxu0 %vm1073_vm4, %v1066_v5  ;;  %v1230_v6 = vsub.s32 4, %v4214_v19 }
 0x757   :  { %3378 = vmatprep.mubr.msk.f32.mxu0 %vm1073_vm4, %v1067_v7  ;;  %3594 = vmatpush3.bf16.msra.mxu0 %v3591_v57 }
 0x758   :  { %v1060_v8 = vpop.permute.xlu1 %1059 }
 0x759   :  { %v1068_v9 = vsel %vm250_vm2, %v4294_v55, %v1060_v8  ;;  %v1238_v8 = vsub.s32 5, %v4214_v19 }
 0x75a   :  { %3379 = vmatmul.mubr.msk.f32.gmra.mrb[14].mxu0 %vm1073_vm4, %v1068_v9  ;;  %v1231_v9 = vrot.slane %v4219_v21, %v1230_v6 }
 0x829   :  { %v3377_v10 = vpop.f32.mrb[12].mxu0 }
 0x82a   :  { %v1158_v11 = vadd.f32 %v3377_v10, %v1072_v52  ;;  %v1152_v12 = vpop.f32.mrb[13].mxu0 }
 0x82b   :  { %v1153_v58 = vadd.f32 %v1152_v12, %v1072_v52 }
 0x82c   :  { %v1172_v15 = vadd.f32 %v1158_v11, %v4199_v14 }
 0x82d   :  { %v3380_v18 = vpop.f32.mrb[14].mxu0  ;;  %v1171_v22 = vadd.f32 %v1153_v58, %v4196_v13  ;;  %v1239_v58 = vrot.slane %v4219_v21, %v1238_v8 }
 0x82e   :  { %v1162_v23 = vpop.f32.mrb[15].mxu0  ;;  %v1178_v55 = vsel %vm142_vm1, %v1172_v15, 0.0  ;;  %v1168_v24 = vadd.f32 %v3380_v18, %v1072_v52 }
 0x82f   :  { %v1163_v25 = vadd.f32 %v1162_v23, %v1072_v52  ;;  %1179 = vadd.xlane.f32.xlu1 %v1178_v55  ;;  %v1175_v26 = vsel %vm142_vm1, %v1171_v22, 0.0 }
 0x830   :  { %1176 = vadd.xlane.f32.xlu0 %v1175_v26  ;;  %v1174_v31 = vadd.f32 %v1168_v24, %v4208_v17 }
 0x831   :  { %v1173_v27 = vadd.f32 %v1163_v25, %v4201_v16 }
 0x832   :  { %v1184_v14 = vsel %vm142_vm1, %v1174_v31, 0.0 }
 0x833   :  { %v1181_v30 = vsel %vm142_vm1, %v1173_v27, 0.0 }
 0x834   :  { %1182 = vadd.xlane.f32.xlu0 %v1181_v30 }
 0x838   :  { %1185 = vadd.xlane.f32.xlu0 %v1184_v14 }
 0x8bc   :  { %v1180_v13 = vpop.xlane.xlu1 %1179 }
 0x8bd   :  { %v1189_v33 = vmul.f32 0.055555556, %v1180_v13  ;;  %v1177_v34 = vpop.xlane.xlu0 %1176  ;;  %v134_v13 = vld [vmem:[#allocation7 + $0x58] sm:$0xff] }
 0x8be   :  { %v1188_v35 = vmul.f32 0.055555556, %v1177_v34 }
 0x8bf   :  { %v1193_v37 = vsub.f32 %v1172_v15, %v1189_v33  ;;  %v136_v33 = vld [vmem:[#allocation7 + $0x78] sm:$0xff] }
 0x8c0   :  { %v1192_v38 = vsub.f32 %v1171_v22, %v1188_v35  ;;  %v3595_v34 = vpack.c.bf16 %v136_v33, %v134_v13  ;;  %v1246_v35 = vsub.s32 2, %v4214_v19  ;;  %v1534_v33 = vld [vmem:[#allocation7 + $0xc0] sm:$0xff] }
 0x8c1   :  { %v1183_v39 = vpop.xlane.xlu0 %1182  ;;  %v1197_v40 = vmul.f32 %v1193_v37, %v1193_v37 }
 0x8c2   :  { %v1190_v41 = vmul.f32 0.055555556, %v1183_v39  ;;  %v1196_v42 = vmul.f32 %v1192_v38, %v1192_v38  ;;  %3596 = vmatprep.subr.bf16.mxu0 %v3595_v34 }
 0x8c3   :  { %v1203_v16 = vsel %vm142_vm1, %v1197_v40, 0.0  ;;  %3598 = vmatpush3.bf16.msra.mxu0 %v3595_v34 }
 0x8c4   :  { %v1194_v43 = vsub.f32 %v1173_v27, %v1190_v41  ;;  %1204 = vadd.xlane.f32.xlu0 %v1203_v16  ;;  %v1200_v17 = vsel %vm142_vm1, %v1196_v42, 0.0 }
 0x8c5   :  { %1201 = vadd.xlane.f32.xlu1 %v1200_v17  ;;  %v1186_v44 = vpop.xlane.xlu0 %1185 }
 0x8c6   :  { %v1191_v28 = vmul.f32 0.055555556, %v1186_v44  ;;  %v1198_v45 = vmul.f32 %v1194_v43, %v1194_v43 }
 0x8c8   :  { %v1195_v46 = vsub.f32 %v1174_v31, %v1191_v28  ;;  %v1206_v32 = vsel %vm142_vm1, %v1198_v45, 0.0 }
 0x8c9   :  { %1207 = vadd.xlane.f32.xlu1 %v1206_v32  ;;  %v1354_v32 = vsub.s32 3, %v4214_v19 }
 0x8ca   :  { %v1199_v29 = vmul.f32 %v1195_v46, %v1195_v46 }
 0x8cc   :  { %v1209_v47 = vsel %vm142_vm1, %v1199_v29, 0.0  ;;  %v1355_v29 = vrot.slane %v4219_v21, %v1354_v32 }
 0x8cd   :  { %1210 = vadd.xlane.f32.xlu0 %v1209_v47 }
 0x951   :  { %v1205_v59 = vpop.xlane.xlu0 %1204 }
 0x952   :  { %v1213_v60 = vmul.f32 0.055555556, %v1205_v59  ;;  %v1202_v61 = vpop.xlane.xlu1 %1201 }
 0x953   :  { %v1212_v62 = vmul.f32 0.055555556, %v1202_v61 }
 0x954   :  { %v1217_v63 = vadd.f32 1e-05, %v1213_v60 }
 0x955   :  { %v1216_v0 = vadd.f32 1e-05, %v1212_v62 }
 0x956   :  { %3804 = vrsqrt.f32 %v1217_v63  ;;  %v1208_v1 = vpop.xlane.xlu1 %1207 }
 0x957   :  { %3806 = vrsqrt.f32 %v1216_v0  ;;  %v1214_v2 = vmul.f32 0.055555556, %v1208_v1 }
 0x959   :  { %v1218_v3 = vadd.f32 1e-05, %v1214_v2 }
 0x95a   :  { %v1211_v4 = vpop.xlane.xlu0 %1210 }
 0x95b   :  { %3808 = vrsqrt.f32 %v1218_v3  ;;  %v1215_v5 = vmul.f32 0.055555556, %v1211_v4 }
 0x95d   :  { %v1219_v7 = vadd.f32 1e-05, %v1215_v5 }
 0x95f   :  { %3810 = vrsqrt.f32 %v1219_v7 }
 0x960   :  { %v3805_v52 = vpop.eup %3804 }
 0x961   :  { %v3807_v10 = vpop.eup %3806  ;;  %v1225_v11 = vmul.f32 %v3805_v52, %v1193_v37  ;;  %v1247_v37 = vrot.slane %v4219_v21, %v1246_v35 }
 0x962   :  { %v1224_v12 = vmul.f32 %v3807_v10, %v1192_v38 }
 0x963   :  { %v1233_v15 = vmul.f32 %v1231_v9, %v1225_v11 }
 0x964   :  { %v1232_v18 = vmul.f32 %v1231_v9, %v1224_v12 }
 0x965   :  { %v3809_v22 = vpop.eup %3808  ;;  %v1241_v24 = vadd.f32 %v1239_v58, %v1233_v15 }
 0x966   :  { %v1240_v23 = vadd.f32 %v1239_v58, %v1232_v18  ;;  %v1226_v55 = vmul.f32 %v3809_v22, %v1194_v43 }
 0x968   :  { %3387 = vmatprep.mubr.msk.f32.mxu1 %vm142_vm1, %v1240_v23  ;;  %v1234_v25 = vmul.f32 %v1231_v9, %v1226_v55 }
 0x969   :  { %v3811_v26 = vpop.eup %3810  ;;  %3388 = vmatmul.mubr.msk.f32.vlgmr.msra.gmra.mrb[8].mxu1 %vm142_vm1, %v1241_v24 }
 0x96a   :  { %v1242_v27 = vadd.f32 %v1239_v58, %v1234_v25  ;;  %v1227_v30 = vmul.f32 %v3811_v26, %v1195_v46 }
 0x96c   :  { %3390 = vmatprep.mubr.msk.f32.mxu1 %vm142_vm1, %v1242_v27  ;;  %v1235_v31 = vmul.f32 %v1231_v9, %v1227_v30 }
 0x96e   :  { %v1243_v14 = vadd.f32 %v1239_v58, %v1235_v31  ;;  %v1526_v31 = vld [vmem:[#allocation7 + $0x80] sm:$0xff] }
 0x970   :  { %3391 = vmatmul.mubr.msk.f32.gmra.mrb[10].mxu1 %vm142_vm1, %v1243_v14 }
 0xa3c   :  { %v3389_v38 = vpop.f32.mrb[8].mxu1 }
 0xa3d   :  { %v1335_v39 = vadd.f32 %v3389_v38, %v1247_v37  ;;  %v1329_v40 = vpop.f32.mrb[9].mxu1 }
 0xa3e   :  { %v1330_v41 = vadd.f32 %v1329_v40, %v1247_v37 }
 0xa3f   :  { %v1349_v16 = vmax.f32 %v1335_v39, 0.0 }
 0xa40   :  { %v1348_v42 = vmax.f32 %v1330_v41, 0.0 }
 0xa42   :  { %3401 = vmatprep.mubr.msk.f32.mxu0 %vm1073_vm4, %v1348_v42 }
 0xa43   :  { %v3392_v43 = vpop.f32.mrb[10].mxu1  ;;  %3402 = vmatmul.mubr.msk.f32.vlgmr.msra.gmra.mrb[16].mxu0 %vm1073_vm4, %v1349_v16 }
 0xa44   :  { %v1345_v17 = vadd.f32 %v3392_v43, %v1247_v37  ;;  %v1339_v44 = vpop.f32.mrb[11].mxu1 }
 0xa45   :  { %v1340_v28 = vadd.f32 %v1339_v44, %v1247_v37  ;;  %v1511_v44 = vsub.s32 6, %v4214_v19 }
 0xa46   :  { %v1351_v46 = vmax.f32 %v1345_v17, 0.0 }
 0xa47   :  { %v1350_v45 = vmax.f32 %v1340_v28, 0.0 }
 0xa49   :  { %3404 = vmatprep.mubr.msk.f32.mxu0 %vm1073_vm4, %v1350_v45 }
 0xa4a   :  { %3405 = vmatmul.mubr.msk.f32.gmra.mrb[18].mxu0 %vm1073_vm4, %v1351_v46  ;;  %v1519_v46 = vsub.s32 7, %v4214_v19 }
 0xb16   :  { %v3403_v47 = vpop.f32.mrb[16].mxu0 }
 0xb17   :  { %v1440_v48 = vadd.f32 %v3403_v47, %v1355_v29  ;;  %v1434_v49 = vpop.f32.mrb[17].mxu0 }
 0xb18   :  { %v1435_v50 = vadd.f32 %v1434_v49, %v1355_v29 }
 0xb19   :  { %v1454_v51 = vadd.f32 %v1440_v48, %v1241_v24 }
 0xb1a   :  { %v1453_v54 = vadd.f32 %v1435_v50, %v1240_v23 }
 0xb1b   :  { %v1460_v56 = vsel %vm142_vm1, %v1454_v51, 0.0 }
 0xb1c   :  { %1461 = vadd.xlane.f32.xlu0 %v1460_v56  ;;  %v1457_v57 = vsel %vm142_vm1, %v1453_v54, 0.0 }
 0xb1d   :  { %1458 = vadd.xlane.f32.xlu1 %v1457_v57  ;;  %v3406_v59 = vpop.f32.mrb[18].mxu0 }
 0xb1e   :  { %v1450_v60 = vadd.f32 %v3406_v59, %v1355_v29  ;;  %v1444_v61 = vpop.f32.mrb[19].mxu0 }
 0xb1f   :  { %v1445_v62 = vadd.f32 %v1444_v61, %v1355_v29  ;;  %v1512_v29 = vrot.slane %v4219_v21, %v1511_v44 }
 0xb20   :  { %v1456_v63 = vadd.f32 %v1450_v60, %v1243_v14  ;;  %v1530_v14 = vld [vmem:[#allocation7 + $0xa0] sm:$0xff] }
 0xb21   :  { %v1455_v0 = vadd.f32 %v1445_v62, %v1242_v27  ;;  %v3599_v13 = vpack.c.bf16 %v1530_v14, %v1526_v31 }
 0xb22   :  { %v1466_v1 = vsel %vm142_vm1, %v1456_v63, 0.0 }
 0xb23   :  { %1467 = vadd.xlane.f32.xlu0 %v1466_v1  ;;  %v1463_v2 = vsel %vm142_vm1, %v1455_v0, 0.0  ;;  %3600 = vmatprep.subr.bf16.mxu1 %v3599_v13 }
 0xb24   :  { %1464 = vadd.xlane.f32.xlu1 %v1463_v2  ;;  %3602 = vmatpush3.bf16.msra.mxu1 %v3599_v13 }
 0xb25   :  { %3411 = vmatprep.subr.msk.mxu1 %vm155_vm0, %v1534_v33 }
 0xb28   :  { %3412 = vmatpush3.msk.msra.mxu1 %vm155_vm0, %v1534_v33 }
 0xba9   :  { %v1462_v3 = vpop.xlane.xlu0 %1461 }
 0xbaa   :  { %v1470_v4 = vmul.f32 0.055555556, %v1462_v3  ;;  %v1459_v5 = vpop.xlane.xlu1 %1458  ;;  %v4407_v3 = vld [vmem:[#allocation8 + $0x8] sm:$0xff] }
 0xbab   :  { %v1469_v7 = vmul.f32 0.055555556, %v1459_v5 }
 0xbac   :  { %v1474_v9 = vsub.f32 %v1454_v51, %v1470_v4  ;;  %v1520_v51 = vrot.slane %v4219_v21, %v1519_v46  ;;  %v1545_v4 = vrot.slane %v4407_v3, %v4217_v20 }
 0xbad   :  { %v1473_v52 = vsub.f32 %v1453_v54, %v1469_v7 }
 0xbae   :  { %v1478_v10 = vmul.f32 %v1474_v9, %v1474_v9 }
 0xbaf   :  { %v1477_v11 = vmul.f32 %v1473_v52, %v1473_v52 }
 0xbb0   :  { %v1468_v12 = vpop.xlane.xlu0 %1467  ;;  %v1484_v58 = vsel %vm142_vm1, %v1478_v10, 0.0 }
 0xbb1   :  { %v1472_v15 = vmul.f32 0.055555556, %v1468_v12  ;;  %v1465_v18 = vpop.xlane.xlu1 %1464  ;;  %1485 = vadd.xlane.f32.xlu0 %v1484_v58  ;;  %v1481_v22 = vsel %vm142_vm1, %v1477_v11, 0.0 }
 0xbb2   :  { %v1471_v23 = vmul.f32 0.055555556, %v1465_v18  ;;  %1482 = vadd.xlane.f32.xlu1 %v1481_v22 }
 0xbb3   :  { %v1476_v55 = vsub.f32 %v1456_v63, %v1472_v15 }
 0xbb4   :  { %v1475_v24 = vsub.f32 %v1455_v0, %v1471_v23 }
 0xbb5   :  { %v1480_v25 = vmul.f32 %v1476_v55, %v1476_v55 }
 0xbb6   :  { %v1479_v26 = vmul.f32 %v1475_v24, %v1475_v24 }
 0xbb7   :  { %v1490_v27 = vsel %vm142_vm1, %v1480_v25, 0.0 }
 0xbb8   :  { %1491 = vadd.xlane.f32.xlu0 %v1490_v27  ;;  %v1487_v30 = vsel %vm142_vm1, %v1479_v26, 0.0 }
 0xbb9   :  { %1488 = vadd.xlane.f32.xlu1 %v1487_v30 }
 0xc3e   :  { %v1486_v34 = vpop.xlane.xlu0 %1485 }
 0xc3f   :  { %v1494_v37 = vmul.f32 0.055555556, %v1486_v34  ;;  %v1483_v38 = vpop.xlane.xlu1 %1482 }
 0xc40   :  { %v1493_v39 = vmul.f32 0.055555556, %v1483_v38 }
 0xc41   :  { %v1498_v40 = vadd.f32 1e-05, %v1494_v37 }
 0xc42   :  { %v1497_v41 = vadd.f32 1e-05, %v1493_v39 }
 0xc43   :  { %3812 = vrsqrt.f32 %v1498_v40 }
 0xc44   :  { %3814 = vrsqrt.f32 %v1497_v41 }
 0xc45   :  { %v1492_v42 = vpop.xlane.xlu0 %1491 }
 0xc46   :  { %v1496_v16 = vmul.f32 0.055555556, %v1492_v42  ;;  %v1489_v43 = vpop.xlane.xlu1 %1488 }
 0xc47   :  { %v1495_v17 = vmul.f32 0.055555556, %v1489_v43 }
 0xc48   :  { %v1500_v28 = vadd.f32 1e-05, %v1496_v16 }
 0xc49   :  { %v1499_v45 = vadd.f32 1e-05, %v1495_v17 }
 0xc4a   :  { %3816 = vrsqrt.f32 %v1500_v28 }
 0xc4b   :  { %3818 = vrsqrt.f32 %v1499_v45 }
 0xc4d   :  { %v3813_v47 = vpop.eup %3812 }
 0xc4e   :  { %v3815_v48 = vpop.eup %3814  ;;  %v1506_v49 = vmul.f32 %v3813_v47, %v1474_v9 }
 0xc4f   :  { %v1505_v50 = vmul.f32 %v3815_v48, %v1473_v52 }
 0xc50   :  { %v1514_v54 = vmul.f32 %v1512_v29, %v1506_v49 }
 0xc51   :  { %v1513_v56 = vmul.f32 %v1512_v29, %v1505_v50 }
 0xc52   :  { %v4393_v60 = vadd.f32 %v1520_v51, %v1514_v54 }
 0xc53   :  { %v4391_v57 = vadd.f32 %v1520_v51, %v1513_v56 }
 0xc54   :  { %v3817_v59 = vpop.eup %3816 }
 0xc55   :  { %v3819_v61 = vpop.eup %3818  ;;  %3413 = vmatprep.mubr.msk.f32.mxu1 %vm142_vm1, %v4391_v57  ;;  %v1508_v62 = vmul.f32 %v3817_v59, %v1476_v55 }
 0xc56   :  { %3414 = vmatmul.mubr.msk.f32.vlgmr.msra.gmra.mrb[12].mxu1 %vm142_vm1, %v4393_v60  ;;  %v1507_v63 = vmul.f32 %v3819_v61, %v1475_v24 }
 0xc57   :  { %v1516_v0 = vmul.f32 %v1512_v29, %v1508_v62 }
 0xc58   :  { %v1515_v1 = vmul.f32 %v1512_v29, %v1507_v63 }
 0xc59   :  { %v4401_v21 = vadd.f32 %v1520_v51, %v1516_v0 }
 0xc5a   :  { %v4399_v2 = vadd.f32 %v1520_v51, %v1515_v1 }
 0xc5c   :  { %3416 = vmatprep.mubr.msk.f32.mxu1 %vm142_vm1, %v4399_v2 }
 0xc5d   :  { %3417 = vmatmul.mubr.msk.f32.gmra.mrb[14].mxu1 %vm142_vm1, %v4401_v21 }
 0xd29   :  { %v3415_v5 = vpop.f32.mrb[12].mxu1 }
 0xd2a   :  { %v4411_v7 = vadd.f32 %v3415_v5, %v1545_v4  ;;  %v1627_v9 = vpop.f32.mrb[13].mxu1 }
 0xd2b   :  { %v4413_v52 = vadd.f32 %v1627_v9, %v1545_v4 }
 0xd2d   :  { %3423 = vmatprep.mubr.msk.f32.mxu0 %vm250_vm2, %v4413_v52  ;;  %v4419_v10 = vpack.i.bf16 %v4411_v7, %v4413_v52 }
 0xd2f   :  { %3733 = vrot.lane.b32.xlu1 %v4419_v10, %s4038_s5 }
 0xd30   :  { %v3418_v11 = vpop.f32.mrb[14].mxu1 }
 0xd31   :  { %v4423_v12 = vadd.f32 %v3418_v11, %v1545_v4  ;;  %v1637_v58 = vpop.f32.mrb[15].mxu1 }
 0xd32   :  { %v4425_v15 = vadd.f32 %v1637_v58, %v1545_v4 }
 0xd34   :  { %3430 = vmatprep.mubr.msk.f32.mxu1 %vm250_vm2, %v4425_v15  ;;  %v4431_v18 = vpack.i.bf16 %v4423_v12, %v4425_v15 }
 0xd36   :  { %3738 = vrot.lane.b32.xlu0 %v4431_v18, %s4038_s5 }
 0xda1   :  { %v3734_v22 = vpop.permute.xlu1 %3733 }
 0xda2   :  { %v3736_v23 = vunpack.i.h.bf16 %v3734_v22  ;;  %v3735_v55 = vunpack.i.l.bf16 %v3734_v22 }
 0xda4   :  { %v3603_v24 = vpack.c.bf16 %v3736_v23, %v3735_v55 }
 0xda6   :  { %3605 = vmatprep.subr.msk.bf16.mxu0 %vm4238_vm3, %v3603_v24 }
 0xda7   :  { %3608 = vmatpush3.bf16.xpose.msk.msra.mxu0 %vm4238_vm3, %v3603_v24 }
 0xda8   :  { %v3739_v25 = vpop.permute.xlu0 %3738 }
 0xda9   :  { %v3741_v26 = vunpack.i.h.bf16 %v3739_v25  ;;  %v3740_v27 = vunpack.i.l.bf16 %v3739_v25 }
 0xdab   :  { %v3609_v30 = vpack.c.bf16 %v3741_v26, %v3740_v27 }
 0xdad   :  { %3611 = vmatprep.subr.msk.bf16.mxu1 %vm4238_vm3, %v3609_v30 }
 0xdae   :  { %3424 = vmatmul.mubr.msk.f32.vlgmr.msra.gmra.mrb[20].mxu0 %vm250_vm2, %v4411_v7  ;;  %3614 = vmatpush3.bf16.xpose.msk.msra.mxu1 %vm4238_vm3, %v3609_v30 }
 0xdb5   :  { %3431 = vmatmul.mubr.msk.f32.vlgmr.msra.gmra.mrb[16].mxu1 %vm250_vm2, %v4423_v12 }
 0xe81   :  { %v3425_v31 = vpop.f32.mrb[20].mxu0 }
 0xe82   :  { %v1825_v14 = vmul.f32 0.33333334, %v3425_v31  ;;  %v1726_v13 = vpop.f32.mrb[21].mxu0 }
 0xe83   :  { %v1824_v33 = vmul.f32 0.33333334, %v1726_v13 }
 0xe84   :  { %v1831_v34 = vsel %vm250_vm2, %v1825_v14, -inf }
 0xe85   :  { %1832 = vmax.xlane.f32.xlu0 %v1831_v34  ;;  %v1828_v37 = vsel %vm250_vm2, %v1824_v33, -inf }
 0xe86   :  { %1829 = vmax.xlane.f32.xlu1 %v1828_v37 }
 0xe88   :  { %v3432_v38 = vpop.f32.mrb[16].mxu1 }
 0xe89   :  { %v1827_v39 = vmul.f32 0.33333334, %v3432_v38  ;;  %v1815_v40 = vpop.f32.mrb[17].mxu1 }
 0xe8a   :  { %v1826_v42 = vmul.f32 0.33333334, %v1815_v40 }
 0xe8b   :  { %v1837_v41 = vsel %vm250_vm2, %v1827_v39, -inf }
 0xe8c   :  { %1838 = vmax.xlane.f32.xlu0 %v1837_v41  ;;  %v1834_v16 = vsel %vm250_vm2, %v1826_v42, -inf }
 0xe97   :  { %3743 = vrot.lane.b32.xlu1 %v4419_v10, %s4039_s13 }
 0xe9b   :  { %3753 = vrot.lane.b32.xlu1 %v4419_v10, %s4040_s14 }
 0xea2   :  { %3748 = vrot.lane.b32.xlu0 %v4431_v18, %s4039_s13 }
 0xebf   :  { %1835 = vmax.xlane.f32.xlu1 %v1834_v16 }
 0xed0   :  { %3758 = vrot.lane.b32.xlu1 %v4431_v18, %s4040_s14 }
 0xf12   :  { %v1833_v43 = vpop.xlane.xlu0 %1832 }
 0xf13   :  { %v1841_v17 = vsub.f32 %v1825_v14, %v1833_v43  ;;  %v1830_v28 = vpop.xlane.xlu1 %1829 }
 0xf14   :  { %v1840_v45 = vsub.f32 %v1824_v33, %v1830_v28 }
 0xf15   :  { %v1846_v29 = vmul.f32 1.442695, %v1841_v17 }
 0xf16   :  { %v1844_v47 = vmul.f32 1.442695, %v1840_v45 }
 0xf17   :  { %3820 = vpow2.f32 %v1846_v29  ;;  %v3744_v48 = vpop.permute.xlu1 %3743 }
 0xf18   :  { %3822 = vpow2.f32 %v1844_v47  ;;  %v3746_v49 = vunpack.i.h.bf16 %v3744_v48  ;;  %v3745_v50 = vunpack.i.l.bf16 %v3744_v48 }
 0xf19   :  { %v1839_v51 = vpop.xlane.xlu0 %1838 }
 0xf1a   :  { %v3615_v54 = vpack.c.bf16 %v3746_v49, %v3745_v50  ;;  %v1843_v56 = vsub.f32 %v1827_v39, %v1839_v51 }
 0xf1b   :  { %v3754_v59 = vpop.permute.xlu1 %3753 }
 0xf1c   :  { %v1850_v61 = vmul.f32 1.442695, %v1843_v56  ;;  %v3756_v62 = vunpack.i.h.bf16 %v3754_v59  ;;  %v3755_v63 = vunpack.i.l.bf16 %v3754_v59  ;;  %3616 = vmatprep.subr.bf16.mxu0 %v3615_v54 }
 0xf1d   :  { %3618 = vmatpush3.bf16.msra.mxu0 %v3615_v54  ;;  %v3749_v0 = vpop.permute.xlu0 %3748 }
 0xf1e   :  { %3824 = vpow2.f32 %v1850_v61  ;;  %v3623_v1 = vpack.c.bf16 %v3756_v62, %v3755_v63  ;;  %v3751_v4 = vunpack.i.h.bf16 %v3749_v0  ;;  %v3750_v5 = vunpack.i.l.bf16 %v3749_v0 }
 0xf20   :  { %v3619_v9 = vpack.c.bf16 %v3751_v4, %v3750_v5  ;;  %3625 = vmatprep.subr.msk.bf16.mxu0 %vm4238_vm3, %v3623_v1 }
 0xf21   :  { %v3821_v11 = vpop.eup %3820 }
 0xf22   :  { %v3823_v58 = vpop.eup %3822  ;;  %3620 = vmatprep.subr.bf16.mxu1 %v3619_v9  ;;  %v1855_v22 = vsel %vm250_vm2, %v3821_v11, 0.0 }
 0xf23   :  { %1856 = vadd.xlane.f32.xlu0 %v1855_v22  ;;  %3622 = vmatpush3.bf16.msra.mxu1 %v3619_v9  ;;  %v1852_v23 = vsel %vm250_vm2, %v3823_v58, 0.0 }
 0xf24   :  { %1853 = vadd.xlane.f32.xlu1 %v1852_v23 }
 0xf28   :  { %v3825_v55 = vpop.eup %3824 }
 0xf29   :  { %v1861_v24 = vsel %vm250_vm2, %v3825_v55, 0.0 }
 0xf2a   :  { %1862 = vadd.xlane.f32.xlu0 %v1861_v24 }
 0xf35   :  { %2048 = vrot.lane.b32.xlu1 %v4411_v7, %s4041_s26 }
 0xf40   :  { %2046 = vrot.lane.b32.xlu0 %v4413_v52, %s4041_s26 }
 0xf44   :  { %2137 = vrot.lane.b32.xlu0 %v4425_v15, %s4041_s26 }
 0xf4c   :  { %v1836_v25 = vpop.xlane.xlu1 %1835 }
 0xf4d   :  { %v1842_v26 = vsub.f32 %v1826_v42, %v1836_v25 }
 0xf4f   :  { %v1848_v27 = vmul.f32 1.442695, %v1842_v26 }
 0xf50   :  { %v3759_v30 = vpop.permute.xlu1 %3758 }
 0xf51   :  { %3826 = vpow2.f32 %v1848_v27  ;;  %v3761_v31 = vunpack.i.h.bf16 %v3759_v30  ;;  %v3760_v14 = vunpack.i.l.bf16 %v3759_v30 }
 0xf53   :  { %v3629_v13 = vpack.c.bf16 %v3761_v31, %v3760_v14 }
 0xf55   :  { %3631 = vmatprep.subr.msk.bf16.mxu1 %vm4238_vm3, %v3629_v13 }
 0xf5b   :  { %v3827_v33 = vpop.eup %3826 }
 0xf5c   :  { %v1858_v7 = vsel %vm250_vm2, %v3827_v33, 0.0 }
 0xf5d   :  { %1859 = vadd.xlane.f32.xlu1 %v1858_v7 }
 0xf6e   :  { %2139 = vrot.lane.b32.xlu1 %v4423_v12, %s4041_s26 }
 0xfb0   :  { %v1857_v52 = vpop.xlane.xlu0 %1856 }
 0xfb1   :  { %3828 = vrcp.f32 %v1857_v52  ;;  %v1854_v15 = vpop.xlane.xlu1 %1853 }
 0xfb2   :  { %3830 = vrcp.f32 %v1854_v15 }
 0xfb5   :  { %v2049_v12 = vpop.permute.xlu1 %2048 }
 0xfb7   :  { %v1863_v34 = vpop.xlane.xlu0 %1862 }
 0xfb8   :  { %3832 = vrcp.f32 %v1863_v34 }
 0xfbb   :  { %v3829_v37 = vpop.eup %3828  ;;  %v2047_v41 = vpop.permute.xlu0 %2046 }
 0xfbc   :  { %v3831_v38 = vpop.eup %3830  ;;  %v1869_v40 = vmul.f32 %v3829_v37, %v3821_v11 }
 0xfbd   :  { %v1868_v39 = vmul.f32 %v3831_v38, %v3823_v58 }
 0xfbf   :  { %3437 = vmatprep.mubr.msk.f32.mxu0 %vm250_vm2, %v1868_v39  ;;  %v2138_v45 = vpop.permute.xlu0 %2137 }
 0xfc0   :  { %3438 = vmatmul.mubr.msk.f32.vlgmr.msra.gmra.mrb[22].mxu0 %vm250_vm2, %v1869_v40 }
 0xfc1   :  { %3628 = vmatpush3.bf16.xpose.msk.msra.mxu0 %vm4238_vm3, %v3623_v1  ;;  %3451 = vmatprep.mubr.msk.f32.mxu0 %vm250_vm2, %v2047_v41 }
 0xfc2   :  { %v3833_v16 = vpop.eup %3832 }
 0xfc3   :  { %v1871_v28 = vmul.f32 %v3833_v16, %v3825_v55 }
 0xfc8   :  { %3452 = vmatmul.mubr.msk.f32.vlgmr.msra.gmra.mrb[24].mxu0 %vm250_vm2, %v2049_v12 }
 0xfea   :  { %v1860_v42 = vpop.xlane.xlu1 %1859 }
 0xfeb   :  { %3834 = vrcp.f32 %v1860_v42 }
 0xfee   :  { %v2140_v29 = vpop.permute.xlu1 %2139 }
 0xff5   :  { %v3835_v43 = vpop.eup %3834 }
 0xff6   :  { %v1870_v17 = vmul.f32 %v3835_v43, %v3827_v33 }
 0xff8   :  { %3444 = vmatprep.mubr.msk.f32.mxu1 %vm250_vm2, %v1870_v17 }
 0xff9   :  { %3445 = vmatmul.mubr.msk.f32.vlgmr.msra.gmra.mrb[18].mxu1 %vm250_vm2, %v1871_v28 }
 0xffa   :  { %3634 = vmatpush3.bf16.xpose.msk.msra.mxu1 %vm4238_vm3, %v3629_v13  ;;  %3458 = vmatprep.mubr.msk.f32.mxu1 %vm250_vm2, %v2138_v45 }
0x1001   :  { %3459 = vmatmul.mubr.msk.f32.vlgmr.msra.gmra.mrb[20].mxu1 %vm250_vm2, %v2140_v29 }
0x1093   :  { %v4487_v47 = vpop.f32.mrb[22].mxu0 }
0x1094   :  { %v4489_v48 = vpop.f32.mrb[23].mxu0 }
0x109b   :  { %v3453_v49 = vpop.f32.mrb[24].mxu0 }
0x109c   :  { %v2229_v50 = vmul.f32 0.33333334, %v3453_v49  ;;  %v2128_v51 = vpop.f32.mrb[25].mxu0 }
0x109d   :  { %v2228_v54 = vmul.f32 0.33333334, %v2128_v51 }
0x109e   :  { %v2235_v56 = vsel %vm250_vm2, %v2229_v50, -inf }
0x109f   :  { %2236 = vmax.xlane.f32.xlu1 %v2235_v56  ;;  %v2232_v59 = vsel %vm250_vm2, %v2228_v54, -inf }
0x10a0   :  { %2233 = vmax.xlane.f32.xlu0 %v2232_v59 }
0x10cc   :  { %v4493_v36 = vpop.f32.mrb[18].mxu1 }
0x10cd   :  { %v4495_v61 = vpop.f32.mrb[19].mxu1 }
0x10d4   :  { %v3460_v62 = vpop.f32.mrb[20].mxu1 }
0x10d5   :  { %v2219_v63 = vpop.f32.mrb[21].mxu1  ;;  %v2231_v1 = vmul.f32 0.33333334, %v3460_v62  ;;  %v1528_v62 = vld [vmem:[#allocation7 + $0x90] sm:$0xff] }
0x10d6   :  { %v2230_v0 = vmul.f32 0.33333334, %v2219_v63  ;;  %v1532_v63 = vld [vmem:[#allocation7 + $0xb0] sm:$0xff] }
0x10d7   :  { %v2241_v5 = vsel %vm250_vm2, %v2231_v1, -inf }
0x10d8   :  { %v2238_v4 = vsel %vm250_vm2, %v2230_v0, -inf }
0x10d9   :  { %2239 = vmax.xlane.f32.xlu0 %v2238_v4  ;;  %v1538_v4 = vld [vmem:[#allocation7 + $0xf0] sm:$0xff] }
0x10dd   :  { %2242 = vmax.xlane.f32.xlu0 %v2241_v5 }
0x112c   :  { %v2237_v9 = vpop.xlane.xlu1 %2236 }
0x112d   :  { %v2245_v11 = vsub.f32 %v2229_v50, %v2237_v9  ;;  %v2234_v58 = vpop.xlane.xlu0 %2233 }
0x112e   :  { %v2244_v22 = vsub.f32 %v2228_v54, %v2234_v58 }
0x112f   :  { %v2250_v23 = vmul.f32 1.442695, %v2245_v11 }
0x1130   :  { %v2248_v55 = vmul.f32 1.442695, %v2244_v22 }
0x1131   :  { %3836 = vpow2.f32 %v2250_v23 }
0x1132   :  { %3838 = vpow2.f32 %v2248_v55 }
0x113b   :  { %v3837_v24 = vpop.eup %3836 }
0x113c   :  { %v3839_v25 = vpop.eup %3838  ;;  %v2259_v26 = vsel %vm250_vm2, %v3837_v24, 0.0 }
0x113d   :  { %2260 = vadd.xlane.f32.xlu0 %v2259_v26  ;;  %v2256_v27 = vsel %vm250_vm2, %v3839_v25, 0.0 }
0x113e   :  { %2257 = vadd.xlane.f32.xlu1 %v2256_v27 }
0x1166   :  { %v2240_v30 = vpop.xlane.xlu0 %2239 }
0x1167   :  { %v2246_v31 = vsub.f32 %v2230_v0, %v2240_v30  ;;  %v3643_v0 = vpack.c.bf16 %v1532_v63, %v1528_v62  ;;  %v1527_v63 = vld [vmem:[#allocation7 + $0x88] sm:$0xff] }
0x1169   :  { %v2252_v14 = vmul.f32 1.442695, %v2246_v31 }
0x116a   :  { %v2243_v13 = vpop.xlane.xlu0 %2242 }
0x116b   :  { %3840 = vpow2.f32 %v2252_v14  ;;  %v2247_v33 = vsub.f32 %v2231_v1, %v2243_v13  ;;  %v1536_v1 = vld [vmem:[#allocation7 + $0xd0] sm:$0xff] }
0x116c   :  { %v3647_v5 = vpack.c.bf16 %v1538_v4, %v1536_v1  ;;  %v1535_v4 = vld [vmem:[#allocation7 + $0xc8] sm:$0xff] }
0x116d   :  { %v2254_v7 = vmul.f32 1.442695, %v2247_v33 }
0x116f   :  { %3842 = vpow2.f32 %v2254_v7 }
0x1175   :  { %v3841_v52 = vpop.eup %3840 }
0x1176   :  { %v2262_v15 = vsel %vm250_vm2, %v3841_v52, 0.0 }
0x1177   :  { %2263 = vadd.xlane.f32.xlu1 %v2262_v15 }
0x1179   :  { %v3843_v34 = vpop.eup %3842 }
0x117a   :  { %v2265_v37 = vsel %vm250_vm2, %v3843_v34, 0.0 }
0x117b   :  { %2266 = vadd.xlane.f32.xlu0 %v2265_v37 }
0x1188   :  { %3763 = vrot.lane.b32.xlu1 %v4419_v10, %s4042_s28 }
0x1191   :  { %3768 = vrot.lane.b32.xlu0 %v4431_v18, %s4042_s28 }
0x11ca   :  { %v2261_v41 = vpop.xlane.xlu0 %2260 }
0x11cb   :  { %v2258_v38 = vpop.xlane.xlu1 %2257 }
0x11cc   :  { %3844 = vrcp.f32 %v2258_v38 }
0x11cd   :  { %3846 = vrcp.f32 %v2261_v41 }
0x11d6   :  { %v3845_v39 = vpop.eup %3844 }
0x11d7   :  { %v2272_v40 = vmul.f32 %v3845_v39, %v3839_v25  ;;  %v3847_v10 = vpop.eup %3846 }
0x11d8   :  { %v2273_v50 = vmul.f32 %v3847_v10, %v3837_v24 }
0x11d9   :  { %3465 = vmatprep.mubr.msk.f32.mxu0 %vm250_vm2, %v2272_v40 }
0x1204   :  { %v2264_v12 = vpop.xlane.xlu1 %2263 }
0x1205   :  { %3848 = vrcp.f32 %v2264_v12 }
0x1208   :  { %v3764_v42 = vpop.permute.xlu1 %3763  ;;  %v2267_v16 = vpop.xlane.xlu0 %2266 }
0x1209   :  { %v3766_v43 = vunpack.i.h.bf16 %v3764_v42  ;;  %v3765_v17 = vunpack.i.l.bf16 %v3764_v42  ;;  %3850 = vrcp.f32 %v2267_v16 }
0x120b   :  { %v3635_v28 = vpack.c.bf16 %v3766_v43, %v3765_v17 }
0x120c   :  { %v3769_v45 = vpop.permute.xlu0 %3768 }
0x120d   :  { %v3771_v29 = vunpack.i.h.bf16 %v3769_v45  ;;  %v3770_v18 = vunpack.i.l.bf16 %v3769_v45  ;;  %3636 = vmatprep.subr.bf16.mxu0 %v3635_v28 }
0x120e   :  { %3638 = vmatpush3.bf16.msra.mxu0 %v3635_v28 }
0x120f   :  { %v3849_v49 = vpop.eup %3848  ;;  %v3639_v51 = vpack.c.bf16 %v3771_v29, %v3770_v18  ;;  %3644 = vmatprep.subr.bf16.mxu0 %v3643_v0 }
0x1210   :  { %v2274_v54 = vmul.f32 %v3849_v49, %v3841_v52 }
0x1211   :  { %3466 = vmatmul.mubr.msk.f32.vlgmr.msra.gmra.mrb[26].mxu0 %vm250_vm2, %v2273_v50  ;;  %3640 = vmatprep.subr.bf16.mxu1 %v3639_v51 }
0x1212   :  { %3642 = vmatpush3.bf16.msra.mxu1 %v3639_v51  ;;  %3472 = vmatprep.mubr.msk.f32.mxu1 %vm250_vm2, %v2274_v54 }
0x1213   :  { %v3851_v56 = vpop.eup %3850  ;;  %3646 = vmatpush3.bf16.msra.mxu0 %v3643_v0  ;;  %v1531_v0 = vld [vmem:[#allocation7 + $0xa8] sm:$0xff] }
0x1214   :  { %v2275_v59 = vmul.f32 %v3851_v56, %v3843_v34  ;;  %3648 = vmatprep.subr.bf16.mxu0 %v3647_v5  ;;  %v3651_v1 = vpack.c.bf16 %v1531_v0, %v1527_v63 }
0x1216   :  { %3473 = vmatmul.mubr.msk.f32.vlgmr.msra.gmra.mrb[22].mxu1 %vm250_vm2, %v2275_v59  ;;  %3652 = vmatprep.subr.bf16.mxu1 %v3651_v1 }
0x1217   :  { %3650 = vmatpush3.bf16.msra.mxu0 %v3647_v5  ;;  %3654 = vmatpush3.bf16.msra.mxu1 %v3651_v1  ;;  %v1529_v5 = vld [vmem:[#allocation7 + $0x98] sm:$0xff] }
0x1218   :  { %3493 = vmatprep.subr.msk.mxu1 %vm155_vm0, %v1535_v4 }
0x121b   :  { %3494 = vmatpush3.msk.msra.mxu1 %vm155_vm0, %v1535_v4 }
0x12e4   :  { %v3467_v9 = vpop.f32.mrb[26].mxu0 }
0x12e5   :  { %v2354_v11 = vpop.f32.mrb[27].mxu0 }
0x12e6   :  { %2454 = vrot.lane.b32.xlu1 %v2354_v11, %s4043_s29 }
0x12e9   :  { %v3474_v58 = vpop.f32.mrb[22].mxu1 }
0x12ea   :  { %2456 = vrot.lane.b32.xlu1 %v3467_v9, %s4043_s29  ;;  %v2441_v22 = vpop.f32.mrb[23].mxu1  ;;  %v1533_v9 = vld [vmem:[#allocation7 + $0xb8] sm:$0xff] }
0x12eb   :  { %2458 = vrot.lane.b32.xlu0 %v2441_v22, %s4043_s29  ;;  %v3655_v11 = vpack.c.bf16 %v1533_v9, %v1529_v5 }
0x12ed   :  { %3656 = vmatprep.subr.bf16.mxu1 %v3655_v11 }
0x12ee   :  { %2460 = vrot.lane.b32.xlu1 %v3474_v58, %s4043_s29 }
0x1358   :  { %v2455_v23 = vpop.permute.xlu1 %2454 }
0x1359   :  { %v2466_v55 = vsel %vm250_vm2, %v4489_v48, %v2455_v23  ;;  %v2473_v48 = vrot.slane %v4407_v3, %v4331_v53 }
0x135a   :  { %3483 = vmatprep.mubr.msk.f32.mxu0 %vm1073_vm4, %v2466_v55 }
0x135c   :  { %v2457_v24 = vpop.permute.xlu1 %2456 }
0x135d   :  { %v2467_v25 = vsel %vm250_vm2, %v4487_v47, %v2457_v24  ;;  %v2459_v26 = vpop.permute.xlu0 %2458 }
0x135e   :  { %v2468_v27 = vsel %vm250_vm2, %v4495_v61, %v2459_v26  ;;  %3484 = vmatmul.mubr.msk.f32.vlgmr.msra.gmra.mrb[28].mxu0 %vm1073_vm4, %v2467_v25 }
0x135f   :  { %3486 = vmatprep.mubr.msk.f32.mxu0 %vm1073_vm4, %v2468_v27 }
0x1360   :  { %v2461_v30 = vpop.permute.xlu1 %2460 }
0x1361   :  { %v2469_v31 = vsel %vm250_vm2, %v4493_v36, %v2461_v30 }
0x1362   :  { %3487 = vmatmul.mubr.msk.f32.gmra.mrb[30].mxu0 %vm1073_vm4, %v2469_v31 }
0x1431   :  { %v3485_v14 = vpop.f32.mrb[28].mxu0 }
0x1432   :  { %v2558_v13 = vadd.f32 %v3485_v14, %v2473_v48  ;;  %v2552_v47 = vpop.f32.mrb[29].mxu0 }
0x1433   :  { %v2553_v33 = vadd.f32 %v2552_v47, %v2473_v48 }
0x1434   :  { %v2572_v7 = vadd.f32 %v2558_v13, %v4393_v60  ;;  %v2630_v13 = vrot.slane %v4407_v3, %v1230_v6 }
0x1435   :  { %v3488_v61 = vpop.f32.mrb[30].mxu0  ;;  %v2571_v52 = vadd.f32 %v2553_v33, %v4391_v57 }
0x1436   :  { %v2562_v15 = vpop.f32.mrb[31].mxu0  ;;  %v2578_v34 = vsel %vm142_vm1, %v2572_v7, 0.0  ;;  %v2568_v37 = vadd.f32 %v3488_v61, %v2473_v48 }
0x1437   :  { %v2563_v38 = vadd.f32 %v2562_v15, %v2473_v48  ;;  %2579 = vadd.xlane.f32.xlu1 %v2578_v34  ;;  %v2575_v36 = vsel %vm142_vm1, %v2571_v52, 0.0 }
0x1438   :  { %2576 = vadd.xlane.f32.xlu0 %v2575_v36  ;;  %v2574_v41 = vadd.f32 %v2568_v37, %v4401_v21 }
0x1439   :  { %v2573_v39 = vadd.f32 %v2563_v38, %v4399_v2 }
0x143a   :  { %v2584_v60 = vsel %vm142_vm1, %v2574_v41, 0.0 }
0x143b   :  { %v2581_v40 = vsel %vm142_vm1, %v2573_v39, 0.0 }
0x143c   :  { %2582 = vadd.xlane.f32.xlu0 %v2581_v40 }
0x1440   :  { %2585 = vadd.xlane.f32.xlu0 %v2584_v60 }
0x14c4   :  { %v2580_v57 = vpop.xlane.xlu1 %2579 }
0x14c5   :  { %v2588_v12 = vmul.f32 0.055555556, %v2580_v57  ;;  %v2577_v42 = vpop.xlane.xlu0 %2576 }
0x14c6   :  { %v2587_v16 = vmul.f32 0.055555556, %v2577_v42  ;;  %v1539_v42 = vld [vmem:[#allocation7 + $0xf8] sm:$0xff] }
0x14c7   :  { %v2592_v43 = vsub.f32 %v2572_v7, %v2588_v12 }
0x14c8   :  { %v2591_v17 = vsub.f32 %v2571_v52, %v2587_v16  ;;  %v2638_v52 = vrot.slane %v4407_v3, %v1238_v8  ;;  %v1537_v8 = vld [vmem:[#allocation7 + $0xd8] sm:$0xff] }
0x14c9   :  { %v2583_v28 = vpop.xlane.xlu0 %2582  ;;  %v2596_v10 = vmul.f32 %v2592_v43, %v2592_v43  ;;  %v3659_v16 = vpack.c.bf16 %v1539_v42, %v1537_v8  ;;  %v2887_v42 = vrot.slane %v4407_v3, %v1519_v46 }
0x14ca   :  { %v2589_v45 = vmul.f32 0.055555556, %v2583_v28  ;;  %v2595_v29 = vmul.f32 %v2591_v17, %v2591_v17 }
0x14cb   :  { %v2602_v2 = vsel %vm142_vm1, %v2596_v10, 0.0 }
0x14cc   :  { %v2593_v18 = vsub.f32 %v2573_v39, %v2589_v45  ;;  %2603 = vadd.xlane.f32.xlu0 %v2602_v2  ;;  %v2599_v21 = vsel %vm142_vm1, %v2595_v29, 0.0 }
0x14cd   :  { %2600 = vadd.xlane.f32.xlu1 %v2599_v21  ;;  %v2586_v49 = vpop.xlane.xlu0 %2585 }
0x14ce   :  { %v2590_v50 = vmul.f32 0.055555556, %v2586_v49  ;;  %v2597_v51 = vmul.f32 %v2593_v18, %v2593_v18 }
0x14d0   :  { %v2594_v54 = vsub.f32 %v2574_v41, %v2590_v50  ;;  %v2605_v56 = vsel %vm142_vm1, %v2597_v51, 0.0 }
0x14d1   :  { %2606 = vadd.xlane.f32.xlu1 %v2605_v56 }
0x14d2   :  { %v2598_v59 = vmul.f32 %v2594_v54, %v2594_v54 }
0x14d4   :  { %v2608_v62 = vsel %vm142_vm1, %v2598_v59, 0.0 }
0x14d5   :  { %2609 = vadd.xlane.f32.xlu0 %v2608_v62 }
0x1559   :  { %v2604_v58 = vpop.xlane.xlu0 %2603 }
0x155a   :  { %v2612_v22 = vmul.f32 0.055555556, %v2604_v58  ;;  %v2601_v23 = vpop.xlane.xlu1 %2600 }
0x155b   :  { %v2611_v55 = vmul.f32 0.055555556, %v2601_v23 }
0x155c   :  { %v2616_v24 = vadd.f32 1e-05, %v2612_v22 }
0x155d   :  { %v2615_v25 = vadd.f32 1e-05, %v2611_v55 }
0x155e   :  { %3852 = vrsqrt.f32 %v2616_v24  ;;  %v2607_v26 = vpop.xlane.xlu1 %2606 }
0x155f   :  { %3854 = vrsqrt.f32 %v2615_v25  ;;  %v2613_v27 = vmul.f32 0.055555556, %v2607_v26 }
0x1561   :  { %v2617_v30 = vadd.f32 1e-05, %v2613_v27 }
0x1562   :  { %v2610_v31 = vpop.xlane.xlu0 %2609 }
0x1563   :  { %3856 = vrsqrt.f32 %v2617_v30  ;;  %v2614_v48 = vmul.f32 0.055555556, %v2610_v31  ;;  %v2891_v31 = vld [vmem:[#allocation10] sm:$0xff] }
0x1565   :  { %v2618_v14 = vadd.f32 1e-05, %v2614_v48  ;;  %v2892_v48 = vld [vmem:[#allocation10 + $0x8] sm:$0xff] }
0x1567   :  { %3858 = vrsqrt.f32 %v2618_v14  ;;  %v3664_v14 = vpack.c.bf16 %v2892_v48, %v2891_v31 }
0x1568   :  { %v3853_v47 = vpop.eup %3852 }
0x1569   :  { %v3855_v33 = vpop.eup %3854  ;;  %v2624_v7 = vmul.f32 %v3853_v47, %v2592_v43  ;;  %v2646_v43 = vrot.slane %v4407_v3, %v1246_v35  ;;  %v2754_v35 = vrot.slane %v4407_v3, %v1354_v32  ;;  %v4046_v47 = vmov 0.0  }
0x156a   :  { %v2623_v61 = vmul.f32 %v3855_v33, %v2591_v17  ;;  %3521 = vmatprep.mubr.msk.f32.mxu0 %vm4045_vm5, %v4046_v47  ;;  %v2893_v33 = vld [vmem:[#allocation10 + $0x10] sm:$0x3] }
0x156b   :  { %v2632_v15 = vmul.f32 %v2630_v13, %v2624_v7  ;;  %v2979_v7 = vld [vmem:[#allocation11] sm:$0xff] }
0x156c   :  { %v2631_v34 = vmul.f32 %v2630_v13, %v2623_v61  ;;  %v2980_v61 = vld [vmem:[#allocation11 + $0x8] sm:$0xff] }
0x156d   :  { %v3857_v37 = vpop.eup %3856  ;;  %v2640_v39 = vadd.f32 %v2638_v52, %v2632_v15 }
0x156e   :  { %v2639_v38 = vadd.f32 %v2638_v52, %v2631_v34  ;;  %v2625_v36 = vmul.f32 %v3857_v37, %v2593_v18 }
0x1570   :  { %3495 = vmatprep.mubr.msk.f32.mxu1 %vm142_vm1, %v2639_v38  ;;  %v2633_v40 = vmul.f32 %v2630_v13, %v2625_v36 }
0x1571   :  { %v3859_v41 = vpop.eup %3858  ;;  %3496 = vmatmul.mubr.msk.f32.vlgmr.msra.gmra.mrb[24].mxu1 %vm142_vm1, %v2640_v39 }
0x1572   :  { %v2641_v6 = vadd.f32 %v2638_v52, %v2633_v40  ;;  %v2626_v60 = vmul.f32 %v3859_v41, %v2594_v54  ;;  %3658 = vmatpush3.bf16.msra.mxu1 %v3655_v11  ;;  %v2881_v41 = vrot.slane %v4407_v3, %v1511_v44  ;;  %v2890_v44 = vld [vmem:[%s4599_s6] sm:$0x3] }
0x1573   :  { %3660 = vmatprep.subr.bf16.mxu1 %v3659_v16 }
0x1574   :  { %3498 = vmatprep.mubr.msk.f32.mxu1 %vm142_vm1, %v2641_v6  ;;  %v2634_v57 = vmul.f32 %v2630_v13, %v2626_v60  ;;  %v4044_v13 = vmov 0.0|0.0  }
0x1575   :  { %3663 = vmatprep.subr.bf16.mxu0 %v4044_v13 }
0x1576   :  { %v2642_v12 = vadd.f32 %v2638_v52, %v2634_v57  ;;  %3662 = vmatpush3.bf16.msra.mxu1 %v3659_v16  ;;  %3665 = vmatpush3.bf16.msra.mxu0 %v3664_v14  ;;  %v3667_v52 = vpack.c.bf16 %v2980_v61, %v2979_v7 }
0x1577   :  { %3666 = vmatprep.subr.bf16.mxu1 %v4044_v13  ;;  %3519 = vmatprep.subr.mxu0 %v4046_v47 }
0x1578   :  { %3499 = vmatmul.mubr.msk.f32.gmra.mrb[26].mxu1 %vm142_vm1, %v2642_v12 }
0x157a   :  { %3520 = vmatpush3.msk.msra.mxu0 %vm155_vm0, %v2893_v33 }
0x1644   :  { %v3497_v17 = vpop.f32.mrb[24].mxu1 }
0x1645   :  { %v2734_v28 = vadd.f32 %v3497_v17, %v2646_v43  ;;  %v2728_v10 = vpop.f32.mrb[25].mxu1 }
0x1646   :  { %v2729_v45 = vadd.f32 %v2728_v10, %v2646_v43  ;;  %v2981_v10 = vld [vmem:[#allocation11 + $0x10] sm:$0xff] }
0x1647   :  { %v2748_v2 = vmax.f32 %v2734_v28, 0.0 }
0x1648   :  { %v2747_v29 = vmax.f32 %v2729_v45, 0.0  ;;  %v2982_v45 = vld [vmem:[#allocation11 + $0x18] sm:$0xff] }
0x164a   :  { %3509 = vmatprep.mubr.msk.f32.mxu1 %vm1073_vm4, %v2747_v29  ;;  %v3670_v29 = vpack.c.bf16 %v2982_v45, %v2981_v10 }
0x164b   :  { %v3500_v18 = vpop.f32.mrb[26].mxu1  ;;  %3510 = vmatmul.mubr.msk.f32.vlgmr.msra.gmra.mrb[28].mxu1 %vm1073_vm4, %v2748_v2  ;;  %v2897_v2 = vrot.slane %v2890_v44, %v4217_v20 }
0x164c   :  { %v2744_v21 = vadd.f32 %v3500_v18, %v2646_v43  ;;  %v2738_v49 = vpop.f32.mrb[27].mxu1  ;;  %3668 = vmatpush3.bf16.msra.mxu1 %v3667_v52 }
0x164d   :  { %v2739_v50 = vadd.f32 %v2738_v49, %v2646_v43  ;;  %3669 = vmatprep.subr.bf16.mxu1 %v4044_v13 }
0x164e   :  { %v2750_v54 = vmax.f32 %v2744_v21, 0.0  ;;  %v2986_v21 = vrot.slane %v2890_v44, %v4331_v53 }
0x164f   :  { %v2749_v51 = vmax.f32 %v2739_v50, 0.0 }
0x1650   :  { %3671 = vmatpush3.bf16.msra.mxu1 %v3670_v29 }
0x1651   :  { %3512 = vmatprep.mubr.msk.f32.mxu1 %vm1073_vm4, %v2749_v51 }
0x1652   :  { %3513 = vmatmul.mubr.msk.f32.gmra.mrb[30].mxu1 %vm1073_vm4, %v2750_v54 }
0x1653   :  { %3532 = vmatprep.mubr.msk.f32.mxu1 %vm4045_vm5, %v4046_v47 }
0x171e   :  { %v3511_v56 = vpop.f32.mrb[28].mxu1 }
0x171f   :  { %v2833_v59 = vpop.f32.mrb[29].mxu1 }
0x1720   :  { %v2834_v62 = vadd.f32 %v2833_v59, %v2754_v35 }
0x1722   :  { %v2850_v63 = vadd.f32 %v2834_v62, %v2639_v38 }
0x1724   :  { %v2852_v0 = vsel %vm142_vm1, %v2850_v63, 0.0 }
0x1725   :  { %2853 = vadd.xlane.f32.xlu0 %v2852_v0  ;;  %v3514_v1 = vpop.f32.mrb[30].mxu1 }
0x1726   :  { %v2842_v4 = vpop.f32.mrb[31].mxu1 }
0x1727   :  { %v2843_v5 = vadd.f32 %v2842_v4, %v2754_v35 }
0x1729   :  { %v2851_v9 = vadd.f32 %v2843_v5, %v2641_v6 }
0x172b   :  { %v2855_v11 = vsel %vm142_vm1, %v2851_v9, 0.0 }
0x172c   :  { %2856 = vadd.xlane.f32.xlu1 %v2855_v11 }
0x17b2   :  { %v2854_v58 = vpop.xlane.xlu0 %2853 }
0x17b3   :  { %v2858_v22 = vmul.f32 0.055555556, %v2854_v58 }
0x17b5   :  { %v2860_v23 = vsub.f32 %v2850_v63, %v2858_v22 }
0x17b7   :  { %v2862_v55 = vmul.f32 %v2860_v23, %v2860_v23 }
0x17b9   :  { %v2857_v24 = vpop.xlane.xlu1 %2856  ;;  %v2864_v32 = vsel %vm142_vm1, %v2862_v55, 0.0 }
0x17ba   :  { %v2859_v25 = vmul.f32 0.055555556, %v2857_v24  ;;  %2865 = vadd.xlane.f32.xlu0 %v2864_v32 }
0x17bc   :  { %v2861_v26 = vsub.f32 %v2851_v9, %v2859_v25 }
0x17be   :  { %v2863_v27 = vmul.f32 %v2861_v26, %v2861_v26 }
0x17c0   :  { %v2867_v30 = vsel %vm142_vm1, %v2863_v27, 0.0 }
0x17c1   :  { %2868 = vadd.xlane.f32.xlu1 %v2867_v30 }
0x1847   :  { %v2866_v15 = vpop.xlane.xlu0 %2865 }
0x1848   :  { %v2870_v34 = vmul.f32 0.055555556, %v2866_v15 }
0x184a   :  { %v2872_v37 = vadd.f32 1e-05, %v2870_v34 }
0x184c   :  { %3860 = vrsqrt.f32 %v2872_v37 }
0x184e   :  { %v2869_v38 = vpop.xlane.xlu1 %2868 }
0x184f   :  { %v2871_v36 = vmul.f32 0.055555556, %v2869_v38 }
0x1851   :  { %v2873_v39 = vadd.f32 1e-05, %v2871_v36 }
0x1853   :  { %3862 = vrsqrt.f32 %v2873_v39 }
0x1856   :  { %v3861_v40 = vpop.eup %3860 }
0x1857   :  { %v2876_v6 = vmul.f32 %v3861_v40, %v2860_v23 }
0x1859   :  { %v2882_v12 = vmul.f32 %v2881_v41, %v2876_v6 }
0x185b   :  { %v2888_v43 = vadd.f32 %v2887_v42, %v2882_v12 }
0x185d   :  { %v3863_v60 = vpop.eup %3862 }
0x185e   :  { %v2877_v57 = vmul.f32 %v3863_v60, %v2861_v26 }
0x1860   :  { %v2883_v8 = vmul.f32 %v2881_v41, %v2877_v57 }
0x1862   :  { %v2889_v16 = vadd.f32 %v2887_v42, %v2883_v8 }
0x1864   :  { %v2900_v17 = vrot.slane %v2889_v16, 7 }
0x1866   :  { %v2902_v28 = vsel %vm2901_vm6, %v2900_v17, %v2888_v43 }
0x1867   :  { %3522 = vmatmul.mubr.msk.f32.vlgmr.msra.gmra.mrb[32].mxu0 %vm142_vm1, %v2902_v28 }
0x193a   :  { %v2974_v19 = vpop.f32.mrb[32].mxu0 }
0x193b   :  { %v2975_v18 = vadd.f32 %v2974_v19, %v2897_v2  ;;  %v3523_v46 = vpop.f32.mrb[33].mxu0 }
0x193d   :  { %v2978_v3 = vmax.f32 %v2975_v18, 0.0 }
0x193f   :  { %3533 = vmatmul.mubr.msk.f32.vlgmr.msra.gmra.mrb[32].mxu1 %vm1073_vm4, %v2978_v3 }
0x1a12   :  { %v3056_v49 = vpop.f32.mrb[32].mxu1 }
0x1a13   :  { %v3057_v50 = vadd.f32 %v3056_v49, %v2986_v21  ;;  %v3534_v51 = vpop.f32.mrb[33].mxu1 }
0x1a15   :  { %3060 = vst [vmem:[#allocation13] sm:$0x3] %v3057_v50 }
0x1a16   :  { %4007 = shalt.err (!%p4004_p10)
}
0x1a17   :  { %s4008_s16 = scalar_lea.hbm %s4600_s7, 32 }
0x1a18   :  { %p4009_p11 = scmp.ne.s32.totalorder %s4600_s7, %s4008_s16  ;;  %p4012_p12 = scmp.lt.u32.totalorder %s4008_s16, %s4600_s7 }
0x1a1a   :  { %p4014_p13 = pnand %p4012_p12, %p4009_p11 }
0x1a1c   :  { %4017 = shalt.err (!%p4014_p13)
}
0x1a1d   :  { %3070 = dma.vmem_to_hbm [thread:$0]  %s3068_s11, 32, %s4600_s7, [#allocation4]  }
0x1a1e   :  { %4026 = dma.done.wait [#allocation4], 32  }
0x1a1f   :  { %4027 = vsyncadd [#allocation4], 4294967264 }
0x1a20   :  { %3074 = vsyncpa [#allocation3], 1 }
0x1a21   :  { %3075 = vsyncpa [#allocation6], 1 }
0x1a22   :  { %3076 = vsyncpa [#allocation9], 1 }
0x1a23   :  { %3077 = vsyncpa [#allocation12], 1 }
0x1a24   :  { %3078 = vsyncpa [#allocation4], 1 }

</bundles_post_ra>
